<compile_context>
chip_gen: v5e
topology: v5e:2x2
jax: 0.10.0
libtpu: 0.0.40
codegen_flags: <defaults>
</compile_context>

<pallas_src>
import functools
import numpy as np

import jax
import jax.numpy as jnp
from jax.experimental import pallas as pl
from jax.experimental.pallas import tpu as pltpu


# ----------------------------------------------------------------------------
# helpers
# ----------------------------------------------------------------------------
def _layernorm(x, gamma, beta, eps=1e-5):
    mu = jnp.mean(x, axis=-1, keepdims=True)
    var = jnp.mean((x - mu) ** 2, axis=-1, keepdims=True)
    return (x - mu) * jax.lax.rsqrt(var + eps) * gamma + beta


def positional_encoding_1d(seq_len, d_model):
    # PositionalEncoding1D (positional_encodings package): interleaved sin/cos.
    # TODO(synk): class definition not in the given snippet; this follows the
    # current positional-encodings package (interleaved sin/cos) variant.
    channels = int(np.ceil(d_model / 2) * 2)
    inv_freq = 1.0 / (10000.0 ** (np.arange(0, channels, 2, dtype=np.float32) / channels))
    pos = np.arange(seq_len, dtype=np.float32)
    sin_inp = np.einsum("i,j->ij", pos, inv_freq)                  # (S, channels/2)
    emb = np.stack([np.sin(sin_inp), np.cos(sin_inp)], axis=-1)    # (S, channels/2, 2)
    emb = emb.reshape(seq_len, channels)[:, :d_model]
    return jnp.asarray(emb, dtype=jnp.float32)


def _default_num_batch_blocks(batch):
    """nb=2 only where it maps to 2 TensorCores (v7x); single-TC chips get nb=1
    so the stacked weights stream from HBM once and matmul M stays large."""
    nb = 1
    try:
        kind = jax.devices()[0].device_kind.lower()
        if "v7" in kind or "7x" in kind:
            nb = 2
    except Exception:
        nb = 1
    if batch % nb != 0:
        nb = 1
    return nb


def _vmem_budget_bytes(bb, s0, s, d_in, d, f):
    """Working set: double-buffered per-layer weights + resident scratch + layer-0
    inputs, with 2x headroom. Keeps pipelining intact beyond the default scoped limit."""
    f32, bf16 = 4, 2
    b = 0
    b += 2 * bb * s0 * d_in * f32                       # x block (double-buffered)
    b += 2 * d_in * d * bf16                            # proj_w (resident)
    b += 2 * s * d * f32                                # addin (resident)
    per_layer = (d * 3 * d + d * d + d * f + f * d) * bf16 + f * f32 + 9 * d * f32
    b += 2 * per_layer                                  # double-buffered layer weights
    b += bb * s * d * f32                               # resident activation scratch
    b += bb * s * 3 * d * f32                           # qkv scratch
    b += bb * s * d * bf16                              # attention context scratch
    b += 2 * bb * d * f32                               # output block
    budget = int(2 * b) + (4 << 20)
    return max(min(budget, 100 << 20), 16 << 20)


# ----------------------------------------------------------------------------
# Fused kernel: projection + cls/PE + L encoder layers + cls-row output
# grid = (num_batch_blocks [parallel], num_layers [arbitrary])
# NOTE: the layer axis MUST remain the innermost "arbitrary" axis — the resident
# act_ref scratch carries the activation from layer l to l+1.
# ----------------------------------------------------------------------------
def _fused_transformer_kernel(n_heads, bb,
                              x_ref, pw_ref, addin_ref,
                              wqkv_ref, wo_ref, w1_ref, w2_ref, b1_ref, vecs_ref,
                              o_ref, act_ref, qkv_ref, ctx_ref):
    lyr = pl.program_id(1)
    S0 = x_ref.shape[1]
    d_in = x_ref.shape[2]
    S = act_ref.shape[1]          # S0 + 1 (cls row)
    D = act_ref.shape[2]
    H = n_heads
    Dh = D // H
    scale = 1.0 / float(np.sqrt(Dh))   # PyTorch MHA: q / sqrt(head_dim)

    # --- grid step lyr == 0: input projection + cls token + positional enc ---
    @pl.when(lyr == 0)
    def _init():
        xf = x_ref[...].reshape(bb * S0, d_in).astype(jnp.bfloat16)
        proj = jnp.dot(xf, pw_ref[...], preferred_element_type=jnp.float32)   # (bb*S0, D)
        addin = addin_ref[...]            # row 0: cls + pe[0]; rows 1..: proj_b + pe[1:]
        body = proj.reshape(bb, S0, D) + addin[1:, :][None, :, :]
        cls_rows = jnp.broadcast_to(addin[0:1, :][None, :, :], (bb, 1, D))
        # one aligned full-block store (no offset-1 masked sublane writes)
        act_ref[...] = jnp.concatenate([cls_rows, body], axis=1)

    # --- one post-LN encoder layer on the resident activation ---------------
    x = act_ref[...].reshape(bb * S, D)                     # f32 activation slab
    xb = x.astype(jnp.bfloat16)
    vec = vecs_ref[0]                                       # (9, D) packed per-layer vectors

    # QKV projection: one matmul on the flattened slab; bias folded per section;
    # staged in VMEM scratch to bound register pressure across the head loop.
    qkv = jnp.dot(xb, wqkv_ref[0], preferred_element_type=jnp.float32)   # (bb*S, 3D)
    qkv_ref[:, 0 * D:1 * D] = qkv[:, 0 * D:1 * D] + vec[0:1, :]
    qkv_ref[:, 1 * D:2 * D] = qkv[:, 1 * D:2 * D] + vec[1:2, :]
    qkv_ref[:, 2 * D:3 * D] = qkv[:, 2 * D:3 * D] + vec[2:3, :]

    # Attention per batch / per head.  Head contexts are lane-concatenated and
    # written to a bf16 scratch so the output projection is ONE K=D matmul.
    for b in range(bb):
        qkv_b = qkv_ref[b * S:(b + 1) * S, :]               # (S, 3D)
        heads = []
        for h in range(H):
            qh = qkv_b[:, h * Dh:(h + 1) * Dh].astype(jnp.bfloat16)
            kh = qkv_b[:, D + h * Dh:D + (h + 1) * Dh].astype(jnp.bfloat16)
            vh = qkv_b[:, 2 * D + h * Dh:2 * D + (h + 1) * Dh].astype(jnp.bfloat16)
            # q . k^T without materializing a transpose
            s = jax.lax.dot_general(qh, kh, (((1,), (1,)), ((), ())),
                                    preferred_element_type=jnp.float32) * scale
            m = jnp.max(s, axis=-1, keepdims=True)
            e = jnp.exp(s - m)                               # (S, S) f32
            denom = jnp.sum(e, axis=-1, keepdims=True)       # (S, 1)
            hd = jnp.dot(e.astype(jnp.bfloat16), vh,
                         preferred_element_type=jnp.float32) # (S, Dh)
            # deferred softmax normalization: scale (S,Dh) instead of dividing (S,S)
            hd = hd * pl.reciprocal(denom, approx=True)
            heads.append(hd.astype(jnp.bfloat16))
        ctx_ref[b * S:(b + 1) * S, :] = jnp.concatenate(heads, axis=1)

    # single full-depth output projection (K = D) over the whole (bb*S, D) slab
    attn = (jnp.dot(ctx_ref[...], wo_ref[0], preferred_element_type=jnp.float32)
            + vec[3:4, :])                                   # + attn-out bias

    # post-LN residual 1 (f32)
    x1 = _layernorm(x + attn, vec[4:5, :], vec[5:6, :])

    # feed-forward (ReLU), flattened slab, bf16 matmuls + f32 accumulate
    h1 = jnp.maximum(
        jnp.dot(x1.astype(jnp.bfloat16), w1_ref[0],
                preferred_element_type=jnp.float32) + b1_ref[0], 0.0)
    h2 = (jnp.dot(h1.astype(jnp.bfloat16), w2_ref[0],
                  preferred_element_type=jnp.float32) + vec[6:7, :])

    # post-LN residual 2 (f32), write back to the resident activation
    x2 = _layernorm(x1 + h2, vec[7:8, :], vec[8:9, :])
    act_ref[...] = x2.reshape(bb, S, D)

    # final layer: emit the cls rows as ONE lane-dense store
    @pl.when(lyr == pl.num_programs(1) - 1)
    def _finalize():
        cls = x2.reshape(bb, S, D)[:, 0, :]                  # (bb, D)
        o_ref[...] = cls.reshape(1, bb, D)


# ----------------------------------------------------------------------------
# Parameters: per-layer weights stacked along a leading L axis; matmul weights
# bf16; all tiny per-layer vectors packed into one (L, 9, D) bank.
#   rows 0..2 : q / k / v bias     row 3 : attn-out bias
#   rows 4,5  : LN1 gamma / beta   row 6 : FFN second-linear bias
#   rows 7,8  : LN2 gamma / beta
# ----------------------------------------------------------------------------
def init_params(key, d_in, d_model, n_heads, dim_ff, num_layers):
    L, D, F = num_layers, d_model, dim_ff
    ks = jax.random.split(key, 10)

    def w(k, shape, dtype=jnp.float32, scale=0.02):
        return (scale * jax.random.normal(k, shape, jnp.float32)).astype(dtype)

    vecs = jnp.concatenate([
        w(ks[3], (L, 3, D)),                            # bq | bk | bv
        w(ks[5], (L, 1, D)),                            # bo
        jnp.ones((L, 1, D), jnp.float32),               # ln1 gamma
        jnp.zeros((L, 1, D), jnp.float32),              # ln1 beta
        w(ks[9], (L, 1, D)),                            # b2
        jnp.ones((L, 1, D), jnp.float32),               # ln2 gamma
        jnp.zeros((L, 1, D), jnp.float32),              # ln2 beta
    ], axis=1)                                          # (L, 9, D)

    return {
        "proj_w": w(ks[0], (d_in, D), jnp.bfloat16),
        "proj_b": jnp.zeros((1, D), jnp.float32),
        "cls_token": jax.random.normal(ks[1], (1, D), jnp.float32),
        # NOTE: weights are stored pre-transposed relative to PyTorch (applied as x @ W);
        # a real weight port must transpose and preserve the packed [q,k,v] ordering.
        "wqkv": w(ks[2], (L, D, 3 * D), jnp.bfloat16),
        "wo":   w(ks[4], (L, D, D), jnp.bfloat16),
        "w1":   w(ks[6], (L, D, F), jnp.bfloat16),
        "w2":   w(ks[8], (L, F, D), jnp.bfloat16),
        "b1":   w(ks[7], (L, 1, F)),
        "vecs": vecs,
    }


# ----------------------------------------------------------------------------
# Forward: one fused pallas_call
# ----------------------------------------------------------------------------
def transformer_block_forward(x, params, pe, n_heads, num_batch_blocks=None):
    B, cb, cc, cd = x.shape
    d_in = cb * cc
    S0 = cd
    S = S0 + 1
    D = params["proj_w"].shape[1]
    L = params["wqkv"].shape[0]
    F = params["w1"].shape[2]

    # rearrange 'a b c d -> a d (b c)'   (tiny XLA glue; fused under jit)
    x_seq = jnp.transpose(x, (0, 3, 1, 2)).reshape(B, S0, d_in)

    # Fold cls token, positional encoding and projection bias into one (S, D)
    # per-row additive term: row 0 = cls + pe[0]; rows 1.. = proj_b + pe[1:].
    addin = jnp.concatenate(
        [params["cls_token"] + pe[0:1, :], params["proj_b"] + pe[1:, :]], axis=0)

    nb = (num_batch_blocks if num_batch_blocks is not None
          else _default_num_batch_blocks(B))
    assert B % nb == 0
    bb = B // nb

    kernel = functools.partial(_fused_transformer_kernel, n_heads, bb)

    def wspec(shape):   # stacked per-layer weight: block indexed by the layer axis
        return pl.BlockSpec((1,) + shape, lambda ib, l: (l, 0, 0))

    def cspec(shape):   # constant (layer-independent) input, resident across the grid
        return pl.BlockSpec(shape, lambda ib, l: (0, 0))

    out = pl.pallas_call(
        kernel,
        out_shape=jax.ShapeDtypeStruct((nb, bb, D), jnp.float32),
        grid=(nb, L),
        in_specs=[
            pl.BlockSpec((bb, S0, d_in), lambda ib, l: (ib, 0, 0)),   # x (rearranged)
            cspec((d_in, D)),                                         # proj_w (bf16)
            cspec((S, D)),                                            # addin (cls/PE/bias)
            wspec((D, 3 * D)),                                        # wqkv (bf16)
            wspec((D, D)),                                            # wo (bf16)
            wspec((D, F)),                                            # w1 (bf16)
            wspec((F, D)),                                            # w2 (bf16)
            wspec((1, F)),                                            # b1
            wspec((9, D)),                                            # packed vectors
        ],
        out_specs=pl.BlockSpec((1, bb, D), lambda ib, l: (ib, 0, 0)),
        scratch_shapes=[
            pltpu.VMEM((bb, S, D), jnp.float32),        # resident activation
            pltpu.VMEM((bb * S, 3 * D), jnp.float32),   # staged QKV
            pltpu.VMEM((bb * S, D), jnp.bfloat16),      # attention context (pre-Wo)
        ],
        compiler_params=pltpu.CompilerParams(
            dimension_semantics=("parallel", "arbitrary"),
            vmem_limit_bytes=_vmem_budget_bytes(bb, S0, S, d_in, D, F)),
    )(x_seq, params["proj_w"], addin,
      params["wqkv"], params["wo"], params["w1"], params["w2"],
      params["b1"], params["vecs"])

    return out.reshape(B, D)                                          # (B, D)


# ----------------------------------------------------------------------------
# Pure-JAX f32 reference (loose sanity check against the bf16 kernel)
# ----------------------------------------------------------------------------
def reference_forward(x, params, pe, n_heads):
    B, cb, cc, cd = x.shape
    D = params["proj_w"].shape[1]
    H = n_heads
    Dh = D // H
    h = jnp.transpose(x, (0, 3, 1, 2)).reshape(B, cd, cb * cc)
    h = h @ params["proj_w"].astype(jnp.float32) + params["proj_b"]
    cls = jnp.broadcast_to(params["cls_token"][None], (B, 1, D))
    h = jnp.concatenate([cls, h], axis=1) + pe[None]
    L = params["wqkv"].shape[0]

    def ln(v, g, b):
        mu = v.mean(-1, keepdims=True)
        var = ((v - mu) ** 2).mean(-1, keepdims=True)
        return (v - mu) * jax.lax.rsqrt(var + 1e-5) * g + b

    for l in range(L):
        vec = params["vecs"][l]                                   # (9, D)
        bqkv = vec[0:3].reshape(-1)                               # (3D,) packed q|k|v
        qkv = h @ params["wqkv"][l].astype(jnp.float32) + bqkv
        q, k, v = qkv[..., :D], qkv[..., D:2 * D], qkv[..., 2 * D:]
        sp = lambda t: t.reshape(B, -1, H, Dh).transpose(0, 2, 1, 3)
        qh, kh, vh = sp(q), sp(k), sp(v)
        s = jnp.einsum("bhqd,bhkd->bhqk", qh, kh) / np.sqrt(Dh)
        p = jax.nn.softmax(s, axis=-1)
        o = jnp.einsum("bhqk,bhkd->bhqd", p, vh).transpose(0, 2, 1, 3).reshape(B, -1, D)
        o = o @ params["wo"][l].astype(jnp.float32) + vec[3]
        h1 = ln(h + o, vec[4], vec[5])
        f = jnp.maximum(h1 @ params["w1"][l].astype(jnp.float32) + params["b1"][l], 0.0)
        f = f @ params["w2"][l].astype(jnp.float32) + vec[6]
        h = ln(h1 + f, vec[7], vec[8])
    return h[:, 0, :]


if __name__ == "__main__":
    # small shapes consistent with the module's forward:
    # x: (a=2, b=4, c=16, d=15) -> seq len 15 (+1 cls = 16), d_in = 64
    B, CB, CC, CD = 2, 4, 16, 15
    d_in = CB * CC            # 64
    d_model = 128
    n_heads = 4
    dim_ff = 256
    num_layers = 3

    key = jax.random.PRNGKey(0)
    kx, kp = jax.random.split(key)
    x = jax.random.normal(kx, (B, CB, CC, CD), jnp.float32)
    params = init_params(kp, d_in, d_model, n_heads, dim_ff, num_layers)
    pe = positional_encoding_1d(CD + 1, d_model)      # hoisted, computed once

    fwd = jax.jit(functools.partial(transformer_block_forward, n_heads=n_heads))
    out = jax.block_until_ready(fwd(x, params, pe))

    assert out.shape == (B, d_model), out.shape
    assert bool(jnp.all(jnp.isfinite(out)))

    # loose sanity check vs f32 reference (kernel uses bf16 matmul operands)
    ref = reference_forward(x, params, pe, n_heads)
    err = float(jnp.max(jnp.abs(out - ref)))
    assert err < 0.25, f"kernel diverges from reference: max|err|={err}"
    print("KERNEL_OK")
</pallas_src>

<mosaic_0001>
module attributes {stable_mosaic.version = 11 : i64} {
  func.func @_fused_transformer_kernel(%arg0: i32, %arg1: i32, %arg2: memref<2x15x64xf32, #tpu.memory_space<vmem>>, %arg3: memref<64x128xbf16, #tpu.memory_space<vmem>>, %arg4: memref<16x128xf32, #tpu.memory_space<vmem>>, %arg5: memref<1x128x384xbf16, #tpu.memory_space<vmem>>, %arg6: memref<1x128x128xbf16, #tpu.memory_space<vmem>>, %arg7: memref<1x128x256xbf16, #tpu.memory_space<vmem>>, %arg8: memref<1x256x128xbf16, #tpu.memory_space<vmem>>, %arg9: memref<1x1x256xf32, #tpu.memory_space<vmem>>, %arg10: memref<1x9x128xf32, #tpu.memory_space<vmem>>, %arg11: memref<1x2x128xf32, #tpu.memory_space<vmem>>, %arg12: memref<2x16x128xf32, #tpu.memory_space<vmem>>, %arg13: memref<32x384xf32, #tpu.memory_space<vmem>>, %arg14: memref<32x128xbf16, #tpu.memory_space<vmem>>) attributes {dimension_semantics = [#tpu.dimension_semantics<parallel>, #tpu.dimension_semantics<arbitrary>], iteration_bounds = array<i64: 1, 3>, scalar_prefetch = 0 : i64, scratch_operands = 3 : i64, tpu.core_type = #tpu.core_type<tc>, window_params = [{transform_indices = @transform_0, window_bounds = array<i64: 2, 15, 64>}, {pipeline_mode = #tpu.pipeline_mode<synchronous>, transform_indices = @transform_1, window_bounds = array<i64: 64, 128>}, {pipeline_mode = #tpu.pipeline_mode<synchronous>, transform_indices = @transform_2, window_bounds = array<i64: 16, 128>}, {transform_indices = @transform_3, window_bounds = array<i64: 1, 128, 384>}, {transform_indices = @transform_4, window_bounds = array<i64: 1, 128, 128>}, {transform_indices = @transform_5, window_bounds = array<i64: 1, 128, 256>}, {transform_indices = @transform_6, window_bounds = array<i64: 1, 256, 128>}, {transform_indices = @transform_7, window_bounds = array<i64: 1, 1, 256>}, {transform_indices = @transform_8, window_bounds = array<i64: 1, 9, 128>}, {transform_indices = @transform_9, window_bounds = array<i64: 1, 2, 128>}]} {
    %c0_i32 = arith.constant 0 : i32
    %0 = arith.cmpi eq, %arg1, %c0_i32 : i32
    %1 = arith.extui %0 : i1 to i32
    %c0_i32_0 = arith.constant 0 : i32
    %2 = arith.cmpi ne, %1, %c0_i32_0 : i32
    scf.if %2 {
      %c0_92 = arith.constant 0 : index
      %c0_93 = arith.constant 0 : index
      %c0_94 = arith.constant 0 : index
      %287 = vector.load %arg2[%c0_92, %c0_93, %c0_94] : memref<2x15x64xf32, #tpu.memory_space<vmem>>, vector<2x15x64xf32>
      %288 = vector.shape_cast %287 : vector<2x15x64xf32> to vector<30x64xf32>
      %289 = arith.truncf %288 : vector<30x64xf32> to vector<30x64xbf16>
      %c0_95 = arith.constant 0 : index
      %c0_96 = arith.constant 0 : index
      %290 = vector.load %arg3[%c0_95, %c0_96] : memref<64x128xbf16, #tpu.memory_space<vmem>>, vector<64x128xbf16>
      %cst_97 = arith.constant dense<0.000000e+00> : vector<30x128xf32>
      %291 = tpu.matmul %289, %290, %cst_97 {dimension_numbers = #tpu.dot_dimension_numbers<[1], [0], [0], [1], [0, 0, 1, 1], [], []>} : vector<30x64xbf16>, vector<64x128xbf16>, vector<30x128xf32> -> vector<30x128xf32>
      %c0_98 = arith.constant 0 : index
      %c0_99 = arith.constant 0 : index
      %292 = vector.load %arg4[%c0_98, %c0_99] : memref<16x128xf32, #tpu.memory_space<vmem>>, vector<16x128xf32>
      %293 = vector.shape_cast %291 : vector<30x128xf32> to vector<2x15x128xf32>
      %294 = vector.extract_strided_slice %292 {offsets = [1, 0], sizes = [15, 128], strides = [1, 1]} : vector<16x128xf32> to vector<15x128xf32>
      %295 = vector.shape_cast %294 : vector<15x128xf32> to vector<1x15x128xf32>
      %296 = vector.broadcast %295 : vector<1x15x128xf32> to vector<2x15x128xf32>
      %297 = arith.addf %293, %296 : vector<2x15x128xf32>
      %298 = vector.extract_strided_slice %292 {offsets = [0, 0], sizes = [1, 128], strides = [1, 1]} : vector<16x128xf32> to vector<1x128xf32>
      %299 = vector.shape_cast %298 : vector<1x128xf32> to vector<1x1x128xf32>
      %300 = vector.shape_cast %299 : vector<1x1x128xf32> to vector<1x1x128xf32>
      %301 = vector.broadcast %300 : vector<1x1x128xf32> to vector<2x1x128xf32>
      %302 = tpu.concatenate %301, %297 in 1 : vector<2x1x128xf32>, vector<2x15x128xf32> -> vector<2x16x128xf32>
      %c0_100 = arith.constant 0 : index
      %c0_101 = arith.constant 0 : index
      %c0_102 = arith.constant 0 : index
      %303 = vector.load %arg12[%c0_100, %c0_101, %c0_102] : memref<2x16x128xf32, #tpu.memory_space<vmem>>, vector<2x16x128xf32>
      tpu.vector_store %arg12[%c0_100, %c0_101, %c0_102], %302 {strides = array<i32>} : memref<2x16x128xf32, #tpu.memory_space<vmem>>, vector<2x16x128xf32>,
    } else {
    }
    %c0 = arith.constant 0 : index
    %c0_1 = arith.constant 0 : index
    %c0_2 = arith.constant 0 : index
    %3 = vector.load %arg12[%c0, %c0_1, %c0_2] : memref<2x16x128xf32, #tpu.memory_space<vmem>>, vector<2x16x128xf32>
    %4 = vector.shape_cast %3 : vector<2x16x128xf32> to vector<32x128xf32>
    %5 = arith.truncf %4 : vector<32x128xf32> to vector<32x128xbf16>
    %c0_3 = arith.constant 0 : index
    %c0_4 = arith.constant 0 : index
    %c0_5 = arith.constant 0 : index
    %6 = vector.load %arg10[%c0_3, %c0_4, %c0_5] : memref<1x9x128xf32, #tpu.memory_space<vmem>>, vector<1x9x128xf32>
    %7 = vector.shape_cast %6 : vector<1x9x128xf32> to vector<9x128xf32>
    %c0_6 = arith.constant 0 : index
    %c0_7 = arith.constant 0 : index
    %c0_8 = arith.constant 0 : index
    %8 = vector.load %arg5[%c0_6, %c0_7, %c0_8] : memref<1x128x384xbf16, #tpu.memory_space<vmem>>, vector<1x128x384xbf16>
    %9 = vector.shape_cast %8 : vector<1x128x384xbf16> to vector<128x384xbf16>
    %cst = arith.constant dense<0.000000e+00> : vector<32x384xf32>
    %10 = tpu.matmul %5, %9, %cst {dimension_numbers = #tpu.dot_dimension_numbers<[1], [0], [0], [1], [0, 0, 1, 1], [], []>} : vector<32x128xbf16>, vector<128x384xbf16>, vector<32x384xf32> -> vector<32x384xf32>
    %11 = vector.extract_strided_slice %10 {offsets = [0, 0], sizes = [32, 128], strides = [1, 1]} : vector<32x384xf32> to vector<32x128xf32>
    %12 = vector.extract_strided_slice %7 {offsets = [0, 0], sizes = [1, 128], strides = [1, 1]} : vector<9x128xf32> to vector<1x128xf32>
    %13 = vector.broadcast %12 : vector<1x128xf32> to vector<32x128xf32>
    %14 = arith.addf %11, %13 : vector<32x128xf32>
    %c0_9 = arith.constant 0 : index
    %c0_10 = arith.constant 0 : index
    %15 = vector.load %arg13[%c0_9, %c0_10] : memref<32x384xf32, #tpu.memory_space<vmem>>, vector<32x128xf32>
    tpu.vector_store %arg13[%c0_9, %c0_10], %14 {strides = array<i32>} : memref<32x384xf32, #tpu.memory_space<vmem>>, vector<32x128xf32>,
    %16 = vector.extract_strided_slice %10 {offsets = [0, 128], sizes = [32, 128], strides = [1, 1]} : vector<32x384xf32> to vector<32x128xf32>
    %17 = vector.extract_strided_slice %7 {offsets = [1, 0], sizes = [1, 128], strides = [1, 1]} : vector<9x128xf32> to vector<1x128xf32>
    %18 = vector.broadcast %17 : vector<1x128xf32> to vector<32x128xf32>
    %19 = arith.addf %16, %18 : vector<32x128xf32>
    %c0_11 = arith.constant 0 : index
    %c128 = arith.constant 128 : index
    %20 = vector.load %arg13[%c0_11, %c128] : memref<32x384xf32, #tpu.memory_space<vmem>>, vector<32x128xf32>
    tpu.vector_store %arg13[%c0_11, %c128], %19 {strides = array<i32>} : memref<32x384xf32, #tpu.memory_space<vmem>>, vector<32x128xf32>,
    %21 = vector.extract_strided_slice %10 {offsets = [0, 256], sizes = [32, 128], strides = [1, 1]} : vector<32x384xf32> to vector<32x128xf32>
    %22 = vector.extract_strided_slice %7 {offsets = [2, 0], sizes = [1, 128], strides = [1, 1]} : vector<9x128xf32> to vector<1x128xf32>
    %23 = vector.broadcast %22 : vector<1x128xf32> to vector<32x128xf32>
    %24 = arith.addf %21, %23 : vector<32x128xf32>
    %c0_12 = arith.constant 0 : index
    %c256 = arith.constant 256 : index
    %25 = vector.load %arg13[%c0_12, %c256] : memref<32x384xf32, #tpu.memory_space<vmem>>, vector<32x128xf32>
    tpu.vector_store %arg13[%c0_12, %c256], %24 {strides = array<i32>} : memref<32x384xf32, #tpu.memory_space<vmem>>, vector<32x128xf32>,
    %c0_13 = arith.constant 0 : index
    %c0_14 = arith.constant 0 : index
    %26 = vector.load %arg13[%c0_13, %c0_14] : memref<32x384xf32, #tpu.memory_space<vmem>>, vector<16x384xf32>
    %27 = vector.extract_strided_slice %26 {offsets = [0, 0], sizes = [16, 32], strides = [1, 1]} : vector<16x384xf32> to vector<16x32xf32>
    %28 = arith.truncf %27 : vector<16x32xf32> to vector<16x32xbf16>
    %29 = vector.extract_strided_slice %26 {offsets = [0, 128], sizes = [16, 32], strides = [1, 1]} : vector<16x384xf32> to vector<16x32xf32>
    %30 = arith.truncf %29 : vector<16x32xf32> to vector<16x32xbf16>
    %31 = vector.extract_strided_slice %26 {offsets = [0, 256], sizes = [16, 32], strides = [1, 1]} : vector<16x384xf32> to vector<16x32xf32>
    %32 = arith.truncf %31 : vector<16x32xf32> to vector<16x32xbf16>
    %cst_15 = arith.constant dense<0.000000e+00> : vector<16x16xf32>
    %33 = tpu.matmul %28, %30, %cst_15 {dimension_numbers = #tpu.dot_dimension_numbers<[1], [1], [0], [0], [0, 0, 1, 0], [], []>} : vector<16x32xbf16>, vector<16x32xbf16>, vector<16x16xf32> -> vector<16x16xf32>
    %cst_16 = arith.constant 0.176776692 : f32
    %34 = vector.broadcast %cst_16 : f32 to vector<16x16xf32>
    %35 = arith.mulf %33, %34 : vector<16x16xf32>
    %cst_17 = arith.constant dense<0xFF800000> : vector<16xf32>
    %36 = vector.multi_reduction <maximumf>, %35, %cst_17 [1] : vector<16x16xf32> to vector<16xf32>
    %37 = vector.shape_cast %36 : vector<16xf32> to vector<16x1xf32>
    %38 = vector.broadcast %37 : vector<16x1xf32> to vector<16x16xf32>
    %39 = arith.subf %35, %38 : vector<16x16xf32>
    %40 = math.exp %39 : vector<16x16xf32>
    %cst_18 = arith.constant dense<0.000000e+00> : vector<16xf32>
    %41 = vector.multi_reduction <add>, %40, %cst_18 [1] : vector<16x16xf32> to vector<16xf32>
    %42 = vector.shape_cast %41 : vector<16xf32> to vector<16x1xf32>
    %43 = arith.truncf %40 : vector<16x16xf32> to vector<16x16xbf16>
    %cst_19 = arith.constant dense<0.000000e+00> : vector<16x32xf32>
    %44 = tpu.matmul %43, %32, %cst_19 {dimension_numbers = #tpu.dot_dimension_numbers<[1], [0], [0], [1], [0, 0, 1, 1], [], []>} : vector<16x16xbf16>, vector<16x32xbf16>, vector<16x32xf32> -> vector<16x32xf32>
    %45 = tpu.reciprocal %42 {approx = true} : vector<16x1xf32> -> vector<16x1xf32>
    %46 = vector.broadcast %45 : vector<16x1xf32> to vector<16x32xf32>
    %47 = arith.mulf %44, %46 : vector<16x32xf32>
    %48 = arith.truncf %47 : vector<16x32xf32> to vector<16x32xbf16>
    %49 = vector.extract_strided_slice %26 {offsets = [0, 32], sizes = [16, 32], strides = [1, 1]} : vector<16x384xf32> to vector<16x32xf32>
    %50 = arith.truncf %49 : vector<16x32xf32> to vector<16x32xbf16>
    %51 = vector.extract_strided_slice %26 {offsets = [0, 160], sizes = [16, 32], strides = [1, 1]} : vector<16x384xf32> to vector<16x32xf32>
    %52 = arith.truncf %51 : vector<16x32xf32> to vector<16x32xbf16>
    %53 = vector.extract_strided_slice %26 {offsets = [0, 288], sizes = [16, 32], strides = [1, 1]} : vector<16x384xf32> to vector<16x32xf32>
    %54 = arith.truncf %53 : vector<16x32xf32> to vector<16x32xbf16>
    %cst_20 = arith.constant dense<0.000000e+00> : vector<16x16xf32>
    %55 = tpu.matmul %50, %52, %cst_20 {dimension_numbers = #tpu.dot_dimension_numbers<[1], [1], [0], [0], [0, 0, 1, 0], [], []>} : vector<16x32xbf16>, vector<16x32xbf16>, vector<16x16xf32> -> vector<16x16xf32>
    %cst_21 = arith.constant 0.176776692 : f32
    %56 = vector.broadcast %cst_21 : f32 to vector<16x16xf32>
    %57 = arith.mulf %55, %56 : vector<16x16xf32>
    %cst_22 = arith.constant dense<0xFF800000> : vector<16xf32>
    %58 = vector.multi_reduction <maximumf>, %57, %cst_22 [1] : vector<16x16xf32> to vector<16xf32>
    %59 = vector.shape_cast %58 : vector<16xf32> to vector<16x1xf32>
    %60 = vector.broadcast %59 : vector<16x1xf32> to vector<16x16xf32>
    %61 = arith.subf %57, %60 : vector<16x16xf32>
    %62 = math.exp %61 : vector<16x16xf32>
    %cst_23 = arith.constant dense<0.000000e+00> : vector<16xf32>
    %63 = vector.multi_reduction <add>, %62, %cst_23 [1] : vector<16x16xf32> to vector<16xf32>
    %64 = vector.shape_cast %63 : vector<16xf32> to vector<16x1xf32>
    %65 = arith.truncf %62 : vector<16x16xf32> to vector<16x16xbf16>
    %cst_24 = arith.constant dense<0.000000e+00> : vector<16x32xf32>
    %66 = tpu.matmul %65, %54, %cst_24 {dimension_numbers = #tpu.dot_dimension_numbers<[1], [0], [0], [1], [0, 0, 1, 1], [], []>} : vector<16x16xbf16>, vector<16x32xbf16>, vector<16x32xf32> -> vector<16x32xf32>
    %67 = tpu.reciprocal %64 {approx = true} : vector<16x1xf32> -> vector<16x1xf32>
    %68 = vector.broadcast %67 : vector<16x1xf32> to vector<16x32xf32>
    %69 = arith.mulf %66, %68 : vector<16x32xf32>
    %70 = arith.truncf %69 : vector<16x32xf32> to vector<16x32xbf16>
    %71 = vector.extract_strided_slice %26 {offsets = [0, 64], sizes = [16, 32], strides = [1, 1]} : vector<16x384xf32> to vector<16x32xf32>
    %72 = arith.truncf %71 : vector<16x32xf32> to vector<16x32xbf16>
    %73 = vector.extract_strided_slice %26 {offsets = [0, 192], sizes = [16, 32], strides = [1, 1]} : vector<16x384xf32> to vector<16x32xf32>
    %74 = arith.truncf %73 : vector<16x32xf32> to vector<16x32xbf16>
    %75 = vector.extract_strided_slice %26 {offsets = [0, 320], sizes = [16, 32], strides = [1, 1]} : vector<16x384xf32> to vector<16x32xf32>
    %76 = arith.truncf %75 : vector<16x32xf32> to vector<16x32xbf16>
    %cst_25 = arith.constant dense<0.000000e+00> : vector<16x16xf32>
    %77 = tpu.matmul %72, %74, %cst_25 {dimension_numbers = #tpu.dot_dimension_numbers<[1], [1], [0], [0], [0, 0, 1, 0], [], []>} : vector<16x32xbf16>, vector<16x32xbf16>, vector<16x16xf32> -> vector<16x16xf32>
    %cst_26 = arith.constant 0.176776692 : f32
    %78 = vector.broadcast %cst_26 : f32 to vector<16x16xf32>
    %79 = arith.mulf %77, %78 : vector<16x16xf32>
    %cst_27 = arith.constant dense<0xFF800000> : vector<16xf32>
    %80 = vector.multi_reduction <maximumf>, %79, %cst_27 [1] : vector<16x16xf32> to vector<16xf32>
    %81 = vector.shape_cast %80 : vector<16xf32> to vector<16x1xf32>
    %82 = vector.broadcast %81 : vector<16x1xf32> to vector<16x16xf32>
    %83 = arith.subf %79, %82 : vector<16x16xf32>
    %84 = math.exp %83 : vector<16x16xf32>
    %cst_28 = arith.constant dense<0.000000e+00> : vector<16xf32>
    %85 = vector.multi_reduction <add>, %84, %cst_28 [1] : vector<16x16xf32> to vector<16xf32>
    %86 = vector.shape_cast %85 : vector<16xf32> to vector<16x1xf32>
    %87 = arith.truncf %84 : vector<16x16xf32> to vector<16x16xbf16>
    %cst_29 = arith.constant dense<0.000000e+00> : vector<16x32xf32>
    %88 = tpu.matmul %87, %76, %cst_29 {dimension_numbers = #tpu.dot_dimension_numbers<[1], [0], [0], [1], [0, 0, 1, 1], [], []>} : vector<16x16xbf16>, vector<16x32xbf16>, vector<16x32xf32> -> vector<16x32xf32>
    %89 = tpu.reciprocal %86 {approx = true} : vector<16x1xf32> -> vector<16x1xf32>
    %90 = vector.broadcast %89 : vector<16x1xf32> to vector<16x32xf32>
    %91 = arith.mulf %88, %90 : vector<16x32xf32>
    %92 = arith.truncf %91 : vector<16x32xf32> to vector<16x32xbf16>
    %93 = vector.extract_strided_slice %26 {offsets = [0, 96], sizes = [16, 32], strides = [1, 1]} : vector<16x384xf32> to vector<16x32xf32>
    %94 = arith.truncf %93 : vector<16x32xf32> to vector<16x32xbf16>
    %95 = vector.extract_strided_slice %26 {offsets = [0, 224], sizes = [16, 32], strides = [1, 1]} : vector<16x384xf32> to vector<16x32xf32>
    %96 = arith.truncf %95 : vector<16x32xf32> to vector<16x32xbf16>
    %97 = vector.extract_strided_slice %26 {offsets = [0, 352], sizes = [16, 32], strides = [1, 1]} : vector<16x384xf32> to vector<16x32xf32>
    %98 = arith.truncf %97 : vector<16x32xf32> to vector<16x32xbf16>
    %cst_30 = arith.constant dense<0.000000e+00> : vector<16x16xf32>
    %99 = tpu.matmul %94, %96, %cst_30 {dimension_numbers = #tpu.dot_dimension_numbers<[1], [1], [0], [0], [0, 0, 1, 0], [], []>} : vector<16x32xbf16>, vector<16x32xbf16>, vector<16x16xf32> -> vector<16x16xf32>
    %cst_31 = arith.constant 0.176776692 : f32
    %100 = vector.broadcast %cst_31 : f32 to vector<16x16xf32>
    %101 = arith.mulf %99, %100 : vector<16x16xf32>
    %cst_32 = arith.constant dense<0xFF800000> : vector<16xf32>
    %102 = vector.multi_reduction <maximumf>, %101, %cst_32 [1] : vector<16x16xf32> to vector<16xf32>
    %103 = vector.shape_cast %102 : vector<16xf32> to vector<16x1xf32>
    %104 = vector.broadcast %103 : vector<16x1xf32> to vector<16x16xf32>
    %105 = arith.subf %101, %104 : vector<16x16xf32>
    %106 = math.exp %105 : vector<16x16xf32>
    %cst_33 = arith.constant dense<0.000000e+00> : vector<16xf32>
    %107 = vector.multi_reduction <add>, %106, %cst_33 [1] : vector<16x16xf32> to vector<16xf32>
    %108 = vector.shape_cast %107 : vector<16xf32> to vector<16x1xf32>
    %109 = arith.truncf %106 : vector<16x16xf32> to vector<16x16xbf16>
    %cst_34 = arith.constant dense<0.000000e+00> : vector<16x32xf32>
    %110 = tpu.matmul %109, %98, %cst_34 {dimension_numbers = #tpu.dot_dimension_numbers<[1], [0], [0], [1], [0, 0, 1, 1], [], []>} : vector<16x16xbf16>, vector<16x32xbf16>, vector<16x32xf32> -> vector<16x32xf32>
    %111 = tpu.reciprocal %108 {approx = true} : vector<16x1xf32> -> vector<16x1xf32>
    %112 = vector.broadcast %111 : vector<16x1xf32> to vector<16x32xf32>
    %113 = arith.mulf %110, %112 : vector<16x32xf32>
    %114 = arith.truncf %113 : vector<16x32xf32> to vector<16x32xbf16>
    %115 = tpu.concatenate %48, %70, %92, %114 in 1 : vector<16x32xbf16>, vector<16x32xbf16>, vector<16x32xbf16>, vector<16x32xbf16> -> vector<16x128xbf16>
    %c0_35 = arith.constant 0 : index
    %c0_36 = arith.constant 0 : index
    %116 = vector.load %arg14[%c0_35, %c0_36] : memref<32x128xbf16, #tpu.memory_space<vmem>>, vector<16x128xbf16>
    tpu.vector_store %arg14[%c0_35, %c0_36], %115 {strides = array<i32>} : memref<32x128xbf16, #tpu.memory_space<vmem>>, vector<16x128xbf16>,
    %c16 = arith.constant 16 : index
    %c0_37 = arith.constant 0 : index
    %117 = vector.load %arg13[%c16, %c0_37] : memref<32x384xf32, #tpu.memory_space<vmem>>, vector<16x384xf32>
    %118 = vector.extract_strided_slice %117 {offsets = [0, 0], sizes = [16, 32], strides = [1, 1]} : vector<16x384xf32> to vector<16x32xf32>
    %119 = arith.truncf %118 : vector<16x32xf32> to vector<16x32xbf16>
    %120 = vector.extract_strided_slice %117 {offsets = [0, 128], sizes = [16, 32], strides = [1, 1]} : vector<16x384xf32> to vector<16x32xf32>
    %121 = arith.truncf %120 : vector<16x32xf32> to vector<16x32xbf16>
    %122 = vector.extract_strided_slice %117 {offsets = [0, 256], sizes = [16, 32], strides = [1, 1]} : vector<16x384xf32> to vector<16x32xf32>
    %123 = arith.truncf %122 : vector<16x32xf32> to vector<16x32xbf16>
    %cst_38 = arith.constant dense<0.000000e+00> : vector<16x16xf32>
    %124 = tpu.matmul %119, %121, %cst_38 {dimension_numbers = #tpu.dot_dimension_numbers<[1], [1], [0], [0], [0, 0, 1, 0], [], []>} : vector<16x32xbf16>, vector<16x32xbf16>, vector<16x16xf32> -> vector<16x16xf32>
    %cst_39 = arith.constant 0.176776692 : f32
    %125 = vector.broadcast %cst_39 : f32 to vector<16x16xf32>
    %126 = arith.mulf %124, %125 : vector<16x16xf32>
    %cst_40 = arith.constant dense<0xFF800000> : vector<16xf32>
    %127 = vector.multi_reduction <maximumf>, %126, %cst_40 [1] : vector<16x16xf32> to vector<16xf32>
    %128 = vector.shape_cast %127 : vector<16xf32> to vector<16x1xf32>
    %129 = vector.broadcast %128 : vector<16x1xf32> to vector<16x16xf32>
    %130 = arith.subf %126, %129 : vector<16x16xf32>
    %131 = math.exp %130 : vector<16x16xf32>
    %cst_41 = arith.constant dense<0.000000e+00> : vector<16xf32>
    %132 = vector.multi_reduction <add>, %131, %cst_41 [1] : vector<16x16xf32> to vector<16xf32>
    %133 = vector.shape_cast %132 : vector<16xf32> to vector<16x1xf32>
    %134 = arith.truncf %131 : vector<16x16xf32> to vector<16x16xbf16>
    %cst_42 = arith.constant dense<0.000000e+00> : vector<16x32xf32>
    %135 = tpu.matmul %134, %123, %cst_42 {dimension_numbers = #tpu.dot_dimension_numbers<[1], [0], [0], [1], [0, 0, 1, 1], [], []>} : vector<16x16xbf16>, vector<16x32xbf16>, vector<16x32xf32> -> vector<16x32xf32>
    %136 = tpu.reciprocal %133 {approx = true} : vector<16x1xf32> -> vector<16x1xf32>
    %137 = vector.broadcast %136 : vector<16x1xf32> to vector<16x32xf32>
    %138 = arith.mulf %135, %137 : vector<16x32xf32>
    %139 = arith.truncf %138 : vector<16x32xf32> to vector<16x32xbf16>
    %140 = vector.extract_strided_slice %117 {offsets = [0, 32], sizes = [16, 32], strides = [1, 1]} : vector<16x384xf32> to vector<16x32xf32>
    %141 = arith.truncf %140 : vector<16x32xf32> to vector<16x32xbf16>
    %142 = vector.extract_strided_slice %117 {offsets = [0, 160], sizes = [16, 32], strides = [1, 1]} : vector<16x384xf32> to vector<16x32xf32>
    %143 = arith.truncf %142 : vector<16x32xf32> to vector<16x32xbf16>
    %144 = vector.extract_strided_slice %117 {offsets = [0, 288], sizes = [16, 32], strides = [1, 1]} : vector<16x384xf32> to vector<16x32xf32>
    %145 = arith.truncf %144 : vector<16x32xf32> to vector<16x32xbf16>
    %cst_43 = arith.constant dense<0.000000e+00> : vector<16x16xf32>
    %146 = tpu.matmul %141, %143, %cst_43 {dimension_numbers = #tpu.dot_dimension_numbers<[1], [1], [0], [0], [0, 0, 1, 0], [], []>} : vector<16x32xbf16>, vector<16x32xbf16>, vector<16x16xf32> -> vector<16x16xf32>
    %cst_44 = arith.constant 0.176776692 : f32
    %147 = vector.broadcast %cst_44 : f32 to vector<16x16xf32>
    %148 = arith.mulf %146, %147 : vector<16x16xf32>
    %cst_45 = arith.constant dense<0xFF800000> : vector<16xf32>
    %149 = vector.multi_reduction <maximumf>, %148, %cst_45 [1] : vector<16x16xf32> to vector<16xf32>
    %150 = vector.shape_cast %149 : vector<16xf32> to vector<16x1xf32>
    %151 = vector.broadcast %150 : vector<16x1xf32> to vector<16x16xf32>
    %152 = arith.subf %148, %151 : vector<16x16xf32>
    %153 = math.exp %152 : vector<16x16xf32>
    %cst_46 = arith.constant dense<0.000000e+00> : vector<16xf32>
    %154 = vector.multi_reduction <add>, %153, %cst_46 [1] : vector<16x16xf32> to vector<16xf32>
    %155 = vector.shape_cast %154 : vector<16xf32> to vector<16x1xf32>
    %156 = arith.truncf %153 : vector<16x16xf32> to vector<16x16xbf16>
    %cst_47 = arith.constant dense<0.000000e+00> : vector<16x32xf32>
    %157 = tpu.matmul %156, %145, %cst_47 {dimension_numbers = #tpu.dot_dimension_numbers<[1], [0], [0], [1], [0, 0, 1, 1], [], []>} : vector<16x16xbf16>, vector<16x32xbf16>, vector<16x32xf32> -> vector<16x32xf32>
    %158 = tpu.reciprocal %155 {approx = true} : vector<16x1xf32> -> vector<16x1xf32>
    %159 = vector.broadcast %158 : vector<16x1xf32> to vector<16x32xf32>
    %160 = arith.mulf %157, %159 : vector<16x32xf32>
    %161 = arith.truncf %160 : vector<16x32xf32> to vector<16x32xbf16>
    %162 = vector.extract_strided_slice %117 {offsets = [0, 64], sizes = [16, 32], strides = [1, 1]} : vector<16x384xf32> to vector<16x32xf32>
    %163 = arith.truncf %162 : vector<16x32xf32> to vector<16x32xbf16>
    %164 = vector.extract_strided_slice %117 {offsets = [0, 192], sizes = [16, 32], strides = [1, 1]} : vector<16x384xf32> to vector<16x32xf32>
    %165 = arith.truncf %164 : vector<16x32xf32> to vector<16x32xbf16>
    %166 = vector.extract_strided_slice %117 {offsets = [0, 320], sizes = [16, 32], strides = [1, 1]} : vector<16x384xf32> to vector<16x32xf32>
    %167 = arith.truncf %166 : vector<16x32xf32> to vector<16x32xbf16>
    %cst_48 = arith.constant dense<0.000000e+00> : vector<16x16xf32>
    %168 = tpu.matmul %163, %165, %cst_48 {dimension_numbers = #tpu.dot_dimension_numbers<[1], [1], [0], [0], [0, 0, 1, 0], [], []>} : vector<16x32xbf16>, vector<16x32xbf16>, vector<16x16xf32> -> vector<16x16xf32>
    %cst_49 = arith.constant 0.176776692 : f32
    %169 = vector.broadcast %cst_49 : f32 to vector<16x16xf32>
    %170 = arith.mulf %168, %169 : vector<16x16xf32>
    %cst_50 = arith.constant dense<0xFF800000> : vector<16xf32>
    %171 = vector.multi_reduction <maximumf>, %170, %cst_50 [1] : vector<16x16xf32> to vector<16xf32>
    %172 = vector.shape_cast %171 : vector<16xf32> to vector<16x1xf32>
    %173 = vector.broadcast %172 : vector<16x1xf32> to vector<16x16xf32>
    %174 = arith.subf %170, %173 : vector<16x16xf32>
    %175 = math.exp %174 : vector<16x16xf32>
    %cst_51 = arith.constant dense<0.000000e+00> : vector<16xf32>
    %176 = vector.multi_reduction <add>, %175, %cst_51 [1] : vector<16x16xf32> to vector<16xf32>
    %177 = vector.shape_cast %176 : vector<16xf32> to vector<16x1xf32>
    %178 = arith.truncf %175 : vector<16x16xf32> to vector<16x16xbf16>
    %cst_52 = arith.constant dense<0.000000e+00> : vector<16x32xf32>
    %179 = tpu.matmul %178, %167, %cst_52 {dimension_numbers = #tpu.dot_dimension_numbers<[1], [0], [0], [1], [0, 0, 1, 1], [], []>} : vector<16x16xbf16>, vector<16x32xbf16>, vector<16x32xf32> -> vector<16x32xf32>
    %180 = tpu.reciprocal %177 {approx = true} : vector<16x1xf32> -> vector<16x1xf32>
    %181 = vector.broadcast %180 : vector<16x1xf32> to vector<16x32xf32>
    %182 = arith.mulf %179, %181 : vector<16x32xf32>
    %183 = arith.truncf %182 : vector<16x32xf32> to vector<16x32xbf16>
    %184 = vector.extract_strided_slice %117 {offsets = [0, 96], sizes = [16, 32], strides = [1, 1]} : vector<16x384xf32> to vector<16x32xf32>
    %185 = arith.truncf %184 : vector<16x32xf32> to vector<16x32xbf16>
    %186 = vector.extract_strided_slice %117 {offsets = [0, 224], sizes = [16, 32], strides = [1, 1]} : vector<16x384xf32> to vector<16x32xf32>
    %187 = arith.truncf %186 : vector<16x32xf32> to vector<16x32xbf16>
    %188 = vector.extract_strided_slice %117 {offsets = [0, 352], sizes = [16, 32], strides = [1, 1]} : vector<16x384xf32> to vector<16x32xf32>
    %189 = arith.truncf %188 : vector<16x32xf32> to vector<16x32xbf16>
    %cst_53 = arith.constant dense<0.000000e+00> : vector<16x16xf32>
    %190 = tpu.matmul %185, %187, %cst_53 {dimension_numbers = #tpu.dot_dimension_numbers<[1], [1], [0], [0], [0, 0, 1, 0], [], []>} : vector<16x32xbf16>, vector<16x32xbf16>, vector<16x16xf32> -> vector<16x16xf32>
    %cst_54 = arith.constant 0.176776692 : f32
    %191 = vector.broadcast %cst_54 : f32 to vector<16x16xf32>
    %192 = arith.mulf %190, %191 : vector<16x16xf32>
    %cst_55 = arith.constant dense<0xFF800000> : vector<16xf32>
    %193 = vector.multi_reduction <maximumf>, %192, %cst_55 [1] : vector<16x16xf32> to vector<16xf32>
    %194 = vector.shape_cast %193 : vector<16xf32> to vector<16x1xf32>
    %195 = vector.broadcast %194 : vector<16x1xf32> to vector<16x16xf32>
    %196 = arith.subf %192, %195 : vector<16x16xf32>
    %197 = math.exp %196 : vector<16x16xf32>
    %cst_56 = arith.constant dense<0.000000e+00> : vector<16xf32>
    %198 = vector.multi_reduction <add>, %197, %cst_56 [1] : vector<16x16xf32> to vector<16xf32>
    %199 = vector.shape_cast %198 : vector<16xf32> to vector<16x1xf32>
    %200 = arith.truncf %197 : vector<16x16xf32> to vector<16x16xbf16>
    %cst_57 = arith.constant dense<0.000000e+00> : vector<16x32xf32>
    %201 = tpu.matmul %200, %189, %cst_57 {dimension_numbers = #tpu.dot_dimension_numbers<[1], [0], [0], [1], [0, 0, 1, 1], [], []>} : vector<16x16xbf16>, vector<16x32xbf16>, vector<16x32xf32> -> vector<16x32xf32>
    %202 = tpu.reciprocal %199 {approx = true} : vector<16x1xf32> -> vector<16x1xf32>
    %203 = vector.broadcast %202 : vector<16x1xf32> to vector<16x32xf32>
    %204 = arith.mulf %201, %203 : vector<16x32xf32>
    %205 = arith.truncf %204 : vector<16x32xf32> to vector<16x32xbf16>
    %206 = tpu.concatenate %139, %161, %183, %205 in 1 : vector<16x32xbf16>, vector<16x32xbf16>, vector<16x32xbf16>, vector<16x32xbf16> -> vector<16x128xbf16>
    %c16_58 = arith.constant 16 : index
    %c0_59 = arith.constant 0 : index
    %207 = vector.load %arg14[%c16_58, %c0_59] : memref<32x128xbf16, #tpu.memory_space<vmem>>, vector<16x128xbf16>
    tpu.vector_store %arg14[%c16_58, %c0_59], %206 {strides = array<i32>} : memref<32x128xbf16, #tpu.memory_space<vmem>>, vector<16x128xbf16>,
    %c0_60 = arith.constant 0 : index
    %c0_61 = arith.constant 0 : index
    %208 = vector.load %arg14[%c0_60, %c0_61] : memref<32x128xbf16, #tpu.memory_space<vmem>>, vector<32x128xbf16>
    %c0_62 = arith.constant 0 : index
    %c0_63 = arith.constant 0 : index
    %c0_64 = arith.constant 0 : index
    %209 = vector.load %arg6[%c0_62, %c0_63, %c0_64] : memref<1x128x128xbf16, #tpu.memory_space<vmem>>, vector<1x128x128xbf16>
    %210 = vector.shape_cast %209 : vector<1x128x128xbf16> to vector<128x128xbf16>
    %cst_65 = arith.constant dense<0.000000e+00> : vector<32x128xf32>
    %211 = tpu.matmul %208, %210, %cst_65 {dimension_numbers = #tpu.dot_dimension_numbers<[1], [0], [0], [1], [0, 0, 1, 1], [], []>} : vector<32x128xbf16>, vector<128x128xbf16>, vector<32x128xf32> -> vector<32x128xf32>
    %212 = vector.extract_strided_slice %7 {offsets = [3, 0], sizes = [1, 128], strides = [1, 1]} : vector<9x128xf32> to vector<1x128xf32>
    %213 = vector.broadcast %212 : vector<1x128xf32> to vector<32x128xf32>
    %214 = arith.addf %211, %213 : vector<32x128xf32>
    %215 = arith.addf %4, %214 : vector<32x128xf32>
    %216 = vector.extract_strided_slice %7 {offsets = [4, 0], sizes = [1, 128], strides = [1, 1]} : vector<9x128xf32> to vector<1x128xf32>
    %217 = vector.extract_strided_slice %7 {offsets = [5, 0], sizes = [1, 128], strides = [1, 1]} : vector<9x128xf32> to vector<1x128xf32>
    %cst_66 = arith.constant dense<0.000000e+00> : vector<32xf32>
    %218 = vector.multi_reduction <add>, %215, %cst_66 [1] : vector<32x128xf32> to vector<32xf32>
    %219 = vector.shape_cast %218 : vector<32xf32> to vector<32x1xf32>
    %cst_67 = arith.constant 1.280000e+02 : f32
    %220 = vector.broadcast %cst_67 : f32 to vector<32x1xf32>
    %221 = arith.divf %219, %220 : vector<32x1xf32>
    %222 = vector.broadcast %221 : vector<32x1xf32> to vector<32x128xf32>
    %223 = arith.subf %215, %222 : vector<32x128xf32>
    %224 = arith.mulf %223, %223 : vector<32x128xf32>
    %cst_68 = arith.constant dense<0.000000e+00> : vector<32xf32>
    %225 = vector.multi_reduction <add>, %224, %cst_68 [1] : vector<32x128xf32> to vector<32xf32>
    %226 = vector.shape_cast %225 : vector<32xf32> to vector<32x1xf32>
    %cst_69 = arith.constant 1.280000e+02 : f32
    %227 = vector.broadcast %cst_69 : f32 to vector<32x1xf32>
    %228 = arith.divf %226, %227 : vector<32x1xf32>
    %229 = vector.broadcast %221 : vector<32x1xf32> to vector<32x128xf32>
    %230 = arith.subf %215, %229 : vector<32x128xf32>
    %cst_70 = arith.constant 9.99999974E-6 : f32
    %231 = vector.broadcast %cst_70 : f32 to vector<32x1xf32>
    %232 = arith.addf %228, %231 : vector<32x1xf32>
    %233 = math.rsqrt %232 : vector<32x1xf32>
    %234 = vector.broadcast %233 : vector<32x1xf32> to vector<32x128xf32>
    %235 = arith.mulf %230, %234 : vector<32x128xf32>
    %236 = vector.broadcast %216 : vector<1x128xf32> to vector<32x128xf32>
    %237 = arith.mulf %235, %236 : vector<32x128xf32>
    %238 = vector.broadcast %217 : vector<1x128xf32> to vector<32x128xf32>
    %239 = arith.addf %237, %238 : vector<32x128xf32>
    %240 = arith.truncf %239 : vector<32x128xf32> to vector<32x128xbf16>
    %c0_71 = arith.constant 0 : index
    %c0_72 = arith.constant 0 : index
    %c0_73 = arith.constant 0 : index
    %241 = vector.load %arg7[%c0_71, %c0_72, %c0_73] : memref<1x128x256xbf16, #tpu.memory_space<vmem>>, vector<1x128x256xbf16>
    %242 = vector.shape_cast %241 : vector<1x128x256xbf16> to vector<128x256xbf16>
    %cst_74 = arith.constant dense<0.000000e+00> : vector<32x256xf32>
    %243 = tpu.matmul %240, %242, %cst_74 {dimension_numbers = #tpu.dot_dimension_numbers<[1], [0], [0], [1], [0, 0, 1, 1], [], []>} : vector<32x128xbf16>, vector<128x256xbf16>, vector<32x256xf32> -> vector<32x256xf32>
    %c0_75 = arith.constant 0 : index
    %c0_76 = arith.constant 0 : index
    %c0_77 = arith.constant 0 : index
    %244 = vector.load %arg9[%c0_75, %c0_76, %c0_77] : memref<1x1x256xf32, #tpu.memory_space<vmem>>, vector<1x1x256xf32>
    %245 = vector.shape_cast %244 : vector<1x1x256xf32> to vector<1x256xf32>
    %246 = vector.broadcast %245 : vector<1x256xf32> to vector<32x256xf32>
    %247 = arith.addf %243, %246 : vector<32x256xf32>
    %cst_78 = arith.constant 0.000000e+00 : f32
    %248 = vector.broadcast %cst_78 : f32 to vector<32x256xf32>
    %249 = arith.maximumf %247, %248 : vector<32x256xf32>
    %250 = arith.truncf %249 : vector<32x256xf32> to vector<32x256xbf16>
    %c0_79 = arith.constant 0 : index
    %c0_80 = arith.constant 0 : index
    %c0_81 = arith.constant 0 : index
    %251 = vector.load %arg8[%c0_79, %c0_80, %c0_81] : memref<1x256x128xbf16, #tpu.memory_space<vmem>>, vector<1x256x128xbf16>
    %252 = vector.shape_cast %251 : vector<1x256x128xbf16> to vector<256x128xbf16>
    %cst_82 = arith.constant dense<0.000000e+00> : vector<32x128xf32>
    %253 = tpu.matmul %250, %252, %cst_82 {dimension_numbers = #tpu.dot_dimension_numbers<[1], [0], [0], [1], [0, 0, 1, 1], [], []>} : vector<32x256xbf16>, vector<256x128xbf16>, vector<32x128xf32> -> vector<32x128xf32>
    %254 = vector.extract_strided_slice %7 {offsets = [6, 0], sizes = [1, 128], strides = [1, 1]} : vector<9x128xf32> to vector<1x128xf32>
    %255 = vector.broadcast %254 : vector<1x128xf32> to vector<32x128xf32>
    %256 = arith.addf %253, %255 : vector<32x128xf32>
    %257 = arith.addf %239, %256 : vector<32x128xf32>
    %258 = vector.extract_strided_slice %7 {offsets = [7, 0], sizes = [1, 128], strides = [1, 1]} : vector<9x128xf32> to vector<1x128xf32>
    %259 = vector.extract_strided_slice %7 {offsets = [8, 0], sizes = [1, 128], strides = [1, 1]} : vector<9x128xf32> to vector<1x128xf32>
    %cst_83 = arith.constant dense<0.000000e+00> : vector<32xf32>
    %260 = vector.multi_reduction <add>, %257, %cst_83 [1] : vector<32x128xf32> to vector<32xf32>
    %261 = vector.shape_cast %260 : vector<32xf32> to vector<32x1xf32>
    %cst_84 = arith.constant 1.280000e+02 : f32
    %262 = vector.broadcast %cst_84 : f32 to vector<32x1xf32>
    %263 = arith.divf %261, %262 : vector<32x1xf32>
    %264 = vector.broadcast %263 : vector<32x1xf32> to vector<32x128xf32>
    %265 = arith.subf %257, %264 : vector<32x128xf32>
    %266 = arith.mulf %265, %265 : vector<32x128xf32>
    %cst_85 = arith.constant dense<0.000000e+00> : vector<32xf32>
    %267 = vector.multi_reduction <add>, %266, %cst_85 [1] : vector<32x128xf32> to vector<32xf32>
    %268 = vector.shape_cast %267 : vector<32xf32> to vector<32x1xf32>
    %cst_86 = arith.constant 1.280000e+02 : f32
    %269 = vector.broadcast %cst_86 : f32 to vector<32x1xf32>
    %270 = arith.divf %268, %269 : vector<32x1xf32>
    %271 = vector.broadcast %263 : vector<32x1xf32> to vector<32x128xf32>
    %272 = arith.subf %257, %271 : vector<32x128xf32>
    %cst_87 = arith.constant 9.99999974E-6 : f32
    %273 = vector.broadcast %cst_87 : f32 to vector<32x1xf32>
    %274 = arith.addf %270, %273 : vector<32x1xf32>
    %275 = math.rsqrt %274 : vector<32x1xf32>
    %276 = vector.broadcast %275 : vector<32x1xf32> to vector<32x128xf32>
    %277 = arith.mulf %272, %276 : vector<32x128xf32>
    %278 = vector.broadcast %258 : vector<1x128xf32> to vector<32x128xf32>
    %279 = arith.mulf %277, %278 : vector<32x128xf32>
    %280 = vector.broadcast %259 : vector<1x128xf32> to vector<32x128xf32>
    %281 = arith.addf %279, %280 : vector<32x128xf32>
    %282 = vector.shape_cast %281 : vector<32x128xf32> to vector<2x16x128xf32>
    %c0_88 = arith.constant 0 : index
    %c0_89 = arith.constant 0 : index
    %c0_90 = arith.constant 0 : index
    %283 = vector.load %arg12[%c0_88, %c0_89, %c0_90] : memref<2x16x128xf32, #tpu.memory_space<vmem>>, vector<2x16x128xf32>
    tpu.vector_store %arg12[%c0_88, %c0_89, %c0_90], %282 {strides = array<i32>} : memref<2x16x128xf32, #tpu.memory_space<vmem>>, vector<2x16x128xf32>,
    %c2_i32 = arith.constant 2 : i32
    %284 = arith.cmpi eq, %arg1, %c2_i32 : i32
    %285 = arith.extui %284 : i1 to i32
    %c0_i32_91 = arith.constant 0 : i32
    %286 = arith.cmpi ne, %285, %c0_i32_91 : i32
    scf.if %286 {
      %287 = vector.shape_cast %281 : vector<32x128xf32> to vector<2x16x128xf32>
      %288 = vector.extract_strided_slice %287 {offsets = [0, 0, 0], sizes = [2, 1, 128], strides = [1, 1, 1]} : vector<2x16x128xf32> to vector<2x1x128xf32>
      %289 = vector.shape_cast %288 : vector<2x1x128xf32> to vector<2x128xf32>
      %290 = vector.shape_cast %289 : vector<2x128xf32> to vector<1x2x128xf32>
      %c0_92 = arith.constant 0 : index
      %c0_93 = arith.constant 0 : index
      %c0_94 = arith.constant 0 : index
      %291 = vector.load %arg11[%c0_92, %c0_93, %c0_94] : memref<1x2x128xf32, #tpu.memory_space<vmem>>, vector<1x2x128xf32>
      tpu.vector_store %arg11[%c0_92, %c0_93, %c0_94], %290 {strides = array<i32>} : memref<1x2x128xf32, #tpu.memory_space<vmem>>, vector<1x2x128xf32>,
    } else {
    }
    return
  }
  func.func @transform_0(%arg0: i32, %arg1: i32) -> (i32, i32, i32) {
    %c0_i32 = arith.constant 0 : i32
    %c0_i32_0 = arith.constant 0 : i32
    %c0_i32_1 = arith.constant 0 : i32
    return %arg0, %c0_i32, %c0_i32_0 : i32, i32, i32
  }
  func.func @transform_1(%arg0: i32, %arg1: i32) -> (i32, i32) {
    %c0_i32 = arith.constant 0 : i32
    %c0_i32_0 = arith.constant 0 : i32
    %c0_i32_1 = arith.constant 0 : i32
    return %c0_i32, %c0_i32_0 : i32, i32
  }
  func.func @transform_2(%arg0: i32, %arg1: i32) -> (i32, i32) {
    %c0_i32 = arith.constant 0 : i32
    %c0_i32_0 = arith.constant 0 : i32
    %c0_i32_1 = arith.constant 0 : i32
    return %c0_i32, %c0_i32_0 : i32, i32
  }
  func.func @transform_3(%arg0: i32, %arg1: i32) -> (i32, i32, i32) {
    %c0_i32 = arith.constant 0 : i32
    %c0_i32_0 = arith.constant 0 : i32
    %c0_i32_1 = arith.constant 0 : i32
    return %arg1, %c0_i32, %c0_i32_0 : i32, i32, i32
  }
  func.func @transform_4(%arg0: i32, %arg1: i32) -> (i32, i32, i32) {
    %c0_i32 = arith.constant 0 : i32
    %c0_i32_0 = arith.constant 0 : i32
    %c0_i32_1 = arith.constant 0 : i32
    return %arg1, %c0_i32, %c0_i32_0 : i32, i32, i32
  }
  func.func @transform_5(%arg0: i32, %arg1: i32) -> (i32, i32, i32) {
    %c0_i32 = arith.constant 0 : i32
    %c0_i32_0 = arith.constant 0 : i32
    %c0_i32_1 = arith.constant 0 : i32
    return %arg1, %c0_i32, %c0_i32_0 : i32, i32, i32
  }
  func.func @transform_6(%arg0: i32, %arg1: i32) -> (i32, i32, i32) {
    %c0_i32 = arith.constant 0 : i32
    %c0_i32_0 = arith.constant 0 : i32
    %c0_i32_1 = arith.constant 0 : i32
    return %arg1, %c0_i32, %c0_i32_0 : i32, i32, i32
  }
  func.func @transform_7(%arg0: i32, %arg1: i32) -> (i32, i32, i32) {
    %c0_i32 = arith.constant 0 : i32
    %c0_i32_0 = arith.constant 0 : i32
    %c0_i32_1 = arith.constant 0 : i32
    return %arg1, %c0_i32, %c0_i32_0 : i32, i32, i32
  }
  func.func @transform_8(%arg0: i32, %arg1: i32) -> (i32, i32, i32) {
    %c0_i32 = arith.constant 0 : i32
    %c0_i32_0 = arith.constant 0 : i32
    %c0_i32_1 = arith.constant 0 : i32
    return %arg1, %c0_i32, %c0_i32_0 : i32, i32, i32
  }
  func.func @transform_9(%arg0: i32, %arg1: i32) -> (i32, i32, i32) {
    %c0_i32 = arith.constant 0 : i32
    %c0_i32_0 = arith.constant 0 : i32
    %c0_i32_1 = arith.constant 0 : i32
    return %arg0, %c0_i32, %c0_i32_0 : i32, i32, i32
  }
}

</mosaic_0001>

<bundles_post_ra>
// kernel: transformer_block_forward.1
= control target key start
LH: loop header
LB: loop body
LE: loop exit
PB: predicated region body
PF: predicated region fallthrough
CT: control target
= control target key end

     0   :  { %s4041_s0 = inlined_call_operand.vmem [shape: f32[2,15,64], index: 0, kind: input, shape index: {}]   ;;  %s4042_s1 = inlined_call_operand.vmem [shape: bf16[64,128], index: 1, kind: input, shape index: {}]   ;;  %s4043_s2 = inlined_call_operand.vmem [shape: f32[16,128], index: 2, kind: input, shape index: {}]   ;;  %s4044_s3 = inlined_call_operand.hbm [shape: bf16[3,128,384], index: 3, kind: input, shape index: {}]   ;;  %s4045_s4 = inlined_call_operand.vmem [shape: bf16[3,128,128], index: 4, kind: input, shape index: {}]   ;;  %s4046_s5 = inlined_call_operand.hbm [shape: bf16[3,128,256], index: 5, kind: input, shape index: {}]   ;;  %s4047_s6 = inlined_call_operand.hbm [shape: bf16[3,256,128], index: 6, kind: input, shape index: {}]   ;;  %s4048_s7 = inlined_call_operand.vmem [shape: f32[3,1,256], index: 7, kind: input, shape index: {}]   ;;  %s4049_s8 = inlined_call_operand.vmem [shape: f32[3,9,128], index: 8, kind: input, shape index: {}]   ;;  %s4050_s9 = inlined_call_operand.hbm [shape: f32[1,2,128], index: 9, kind: output, shape index: {}]  }
   0x1   :  { %4054 = sst [smem:[#allocation19_spill]] %s4046_s5 }
   0x2   :  { %4055 = sst [smem:[#allocation20_spill]] %s4047_s6 }
   0x3   :  { %4056 = sst [smem:[#allocation21_spill]] %s4050_s9 }
   0x4   :  { %14 = vsyncpa [#allocation6], 0 }
   0x5   :  { %16 = vsyncpa [#allocation6 + $0x1], 0 }
   0x6   :  { %17 = vsyncpa [#allocation9], 0 }
   0x7   :  { %19 = vsyncpa [#allocation9 + $0x1], 0 }
   0x8   :  { %20 = vsyncpa [#allocation7], 0  ;;  %s3432_s30 = smov 0   ;;  %s3434_s10 = smov 0  }
   0x9   :  { %s3436_s11 = smov 0   ;;  %s3438_s12 = smov 0  }
   0xa   :  { %s3440_s13 = smov 0   ;;  %s3442_s14 = smov 0  }
   0xb LB: > { %4057 = sst [smem:[#allocation15_spill]] %s3357_s11  ;;  %s3461_s15 = sadd.s32 4294967295, %s3369_s14   ;;  %s3369_s14 = sphi %s3442_s14, %s26_s14   ;;  %s3365_s13 = sphi %s3440_s13, %s4074_s13   ;;  %s3361_s12 = sphi %s3438_s12, %s4073_s12   ;;  %s3357_s11 = sphi %s3436_s11, %s4069_s11   ;;  %s3353_s10 = sphi %s3434_s10, %s4072_s10   ;;  %s3349_s30 = sphi %s3432_s30, %s4071_s30  }
   0xc   : > { %4058 = sst [smem:[#allocation16_spill]] %s3369_s14  ;;  %s35_s16 = sadd.s32 1, %s3365_s13 }
   0xd   : > { %p36_p0 = scmp.ge.s32.totalorder %s35_s16, 3  ;;  %s113_s17 = sadd.s32 1, %s3357_s11 }
   0xe   : > { %p120_p1 = scmp.ne.s32.totalorder %s3357_s11, %s3353_s10  ;;  %p121_p2 = scmp.eq.s32.totalorder %s3369_s14, 0 }
   0xf   : > { %s4076_s16 = smov (%p36_p0, %s35_s16), 0  ;;  %p126_p4 = scmp.ne.s32.totalorder %s3353_s10, %s3349_s30 }
  0x10   : > { %4059 = sst [smem:[#allocation17_spill]] %s4076_s16  ;;  %p122_p3 = por %p121_p2, %p120_p1 }
  0x11   : > { %s110_s18 = ssub.s32 %s3365_s13, %s4076_s16  ;;  %p127_p5 = scmp.eq.s32.totalorder %s3461_s15, 0 }
  0x12   : > { %p111_p6 = scmp.eq.s32.totalorder %s110_s18, 0  ;;  %p3047_p8 = scmp.lt.s32.totalorder %s3369_s14, 3 }
  0x13   : > { %p3474_p7 = por %p127_p5, %p126_p4  ;;  %s3483_s21 = sand.u32 1, %s3357_s11  }
  0x14   : > { %s3480_s20 = scalar_select %p111_p6, %s3357_s11, %s113_s17  }
  0x15   : > { %p3485_p9 = pnand %p3047_p8, %p122_p3  ;;  %s352_s23 = sand.u32 1, %s3369_s14  }
  0x16   : > { %4061 = sst [smem:[#allocation18_spill]] %s3480_s20  ;;  %s2628_s24 = sshll.u32 %s3483_s21, 7 }
  0x17   : > { %s2946_s25 = sshll.u32 %s3365_s13, 7  ;;  %s4063_s5 = sld [smem:[#allocation19_spill]] }
  0x18   : > { %s356_s29 = scalar_lea.vmem [#allocation8], %s2628_s24  ;;  %s3495_s18 = scalar_lea.sflag [#allocation9], %s352_s23 }
  0x19   : > { %s364_s30 = sshll.u32 %s356_s29, 4  ;;  %s3371_s16 = smov 128   ;;  %s365_s30 = int_to_ptr.vmem [resolvable:$true] %s364_s30 }
  0x1a   : > { %s3372_s20 = smov 8   ;;  %s4064_s6 = sld [smem:[#allocation20_spill]] }
  0x1b   : > { %s378_s27 = scalar_lea.vmem [#allocation10], %s2628_s24  ;;  %p2634_p10 = scmp.ge.s32.totalorder %s3369_s14, 1 }
  0x1c   : > { %p409_p11 = scmp.lt.s32.totalorder %s3369_s14, 4  ;;  %s3376_s14 = smov 4  }
  0x1d   : > { %s361_s28 = scalar_lea.hbm %s4063_s5, %s2946_s25  ;;  %s386_s5 = sshll.u32 %s378_s27, 4  ;;  %s387_s5 = int_to_ptr.vmem [resolvable:$true] %s386_s5 }
  0x1e   : > { %s362_s17 = sshll.u32 %s361_s28, 4  ;;  %p3505_p12 = pnand %p2634_p10, %p409_p11  ;;  %s363_s17 = int_to_ptr.hbm [resolvable:$true] %s362_s17 }
  0x1f   : > { %3043 = dma.hbm_to_vmem [thread:$0]  (!%p3485_p9), %s363_s17, 2048, %s365_s30, %s3495_s18, %s3371_s16, %s3371_s16, %s3372_s20  }
  0x20   : > { %s383_s26 = scalar_lea.hbm %s4064_s6, %s2946_s25  ;;  %s3024_s16 = smul.u32 192, %s3483_s21 }
  0x21   : > { %s384_s29 = sshll.u32 %s383_s26, 4  ;;  %s3025_s20 = smul.u32 192, %s3365_s13  ;;  %s385_s29 = int_to_ptr.hbm [resolvable:$true] %s384_s29 }
  0x22   : > { %s326_s24 = scalar_lea.vmem [#allocation5], %s3024_s16  ;;  %s323_s17 = scalar_lea.sflag [#allocation6], %s3483_s21 }
  0x23   : > { %s331_s11 = scalar_lea.hbm %s4044_s3, %s3025_s20  ;;  %s334_s25 = sshll.u32 %s326_s24, 4  ;;  %s335_s25 = int_to_ptr.vmem [resolvable:$true] %s334_s25 }
  0x24   : > { %s332_s30 = sshll.u32 %s331_s11, 4  ;;  %s3373_s26 = smov 192   ;;  %s333_s30 = int_to_ptr.hbm [resolvable:$true] %s332_s30 }
  0x25   : > { %s3374_s27 = smov 12   ;;  %s3375_s6 = smov 64  }
  0x26   : > { %3040 = dma.hbm_to_vmem [thread:$0]  (!%p3485_p9), %s333_s30, 3072, %s335_s25, %s323_s17, %s3373_s26, %s3373_s26, %s3374_s27  }
  0x27   : > { %3046 = dma.hbm_to_vmem [thread:$0]  (!%p3485_p9), %s385_s29, 2048, %s387_s5, %s3495_s18, %s3375_s6, %s3375_s6, %s3376_s14  }
  0x28   : > { %413 = sbr.rel (%p3505_p12) target bundleno = 2343 (0x927), region = 56  ;;  %s415_s20 = sand.u32 (!%p3505_p12), 1, %s3353_s10  }
  0x29   : > { %s3026_s16 = smul.u32 (!%p3505_p12), 192, %s415_s20  ;;  %s416_s28 = scalar_lea.sflag (!%p3505_p12), [#allocation6], %s415_s20 }
  0x2b   : > { %s3523_s9 = scalar_lea.vmem (!%p3505_p12), [#allocation5], %s3026_s16 }
  0x2d   : > { %3336 = dma.done.wait (%p3474_p7), %s416_s28, 3072  }
  0x2e   : > { %3338 = vsyncadd (%p3474_p7), %s416_s28, 4294964224  ;;  %s425_s21 = sand.u32 1, %s3461_s15   ;;  %s2635_s22 = sshll.u32 %s415_s20, 7 }
  0x2f   : > { %s426_s5 = scalar_lea.sflag [#allocation9], %s425_s21  ;;  %s3530_s6 = scalar_lea.vmem [#allocation8], %s2635_s22 }
  0x30   : > { %3340 = dma.done.wait (%p3474_p7), %s426_s5, 4096  }
  0x31   : > { %3342 = vsyncadd (%p3474_p7), %s426_s5, 4294963200  ;;  %p507_p13 = scmp.lt.s32.totalorder %s3361_s12, 2  ;;  %s3553_s16 = scalar_lea.vmem [#allocation10], %s2635_s22 }
  0x32   : > { %p2642_p0 = scmp.ne.s32.totalorder %s3361_s12, 0 }
  0x33   : > { %s508_s14 = scalar_select %p507_p13, %s3361_s12, 2 }
  0x34   : > { %525 = sbr.rel (%p2642_p0) target bundleno = 279 (0x117), region = 72 }
  0x35   : > { %s2948_s18 = sshll.u32 %s508_s14, 6  ;;  %s2639_s29 = sshll.u32 %s508_s14, 1 }
  0x36   : > { %s3541_s24 = scalar_lea.vmem %s4045_s4, %s2948_s18  ;;  %s3546_s17 = scalar_lea.vmem %s4048_s7, %s2639_s29 }
  0x37   : > { %s2949_s26 = sshll.u32 %s508_s14, 4 }
  0x38   : > { %s3551_s20 = scalar_lea.vmem %s4049_s8, %s2949_s26 }
  0x39   : > { %v2953_v0 = vld [vmem:[%s4042_s1 + $0x18] sm:$0xff]  ;;  %v526_v1 = vld [vmem:[%s4041_s0] sm:$0xff]  ;;  %v2952_v2 = vld [vmem:[%s4042_s1 + $0x10] sm:$0xff]  ;;  %vm639_vm0 = vcmask 523264   ;;  %vm901_vm1 = vcmask 1040384  }
  0x3a   : > { %650 = vmatpush.bf16.msra.mxu0 %v2953_v0  ;;  %v534_v3 = vrot.slane %v526_v1, 1  ;;  %v535_v4 = vrot.slane %v526_v1, 2  ;;  %v536_v5 = vrot.slane %v526_v1, 3  ;;  %3020 = vmatpush.bf16.msra.mxu1 %v2953_v0  ;;  %v537_v6 = vrot.slane %v526_v1, 4  ;;  %560 = vst [vmem:[#allocation1] ss:$9 sm:$0xff] %v526_v1 }
  0x3b   : > { %v538_v7 = vrot.slane %v526_v1, 5  ;;  %v539_v8 = vrot.slane %v526_v1, 6  ;;  %v2951_v9 = vld [vmem:[%s4042_s1 + $0x8] sm:$0xff]  ;;  %v540_v10 = vrot.slane %v526_v1, 7  ;;  %v2950_v11 = vld [vmem:[%s4042_s1] sm:$0xff]  ;;  %v528_v20 = vld [vmem:[%s4041_s0 + $0x10] sm:$0xff] }
  0x3c   : > { %562 = vst [vmem:[#allocation1 + $0x1] ss:$9 sm:$0xff] %v534_v3  ;;  %v527_v12 = vld [vmem:[%s4041_s0 + $0x8] sm:$0x7f]  ;;  %v547_v21 = vrot.slane %v528_v20, 1  ;;  %v548_v22 = vrot.slane %v528_v20, 2 }
  0x3d   : > { %564 = vst [vmem:[#allocation1 + $0x2] ss:$9 sm:$0xff] %v535_v4  ;;  %v541_v13 = vrot.slane %v527_v12, 1  ;;  %v542_v14 = vrot.slane %v527_v12, 2  ;;  %v543_v15 = vrot.slane %v527_v12, 3  ;;  %v544_v17 = vrot.slane %v527_v12, 4 }
  0x3e   : > { %651 = vmatpush.bf16.msra.mxu0 %v2952_v2  ;;  %566 = vst [vmem:[#allocation1 + $0x3] ss:$9 sm:$0xff] %v536_v5  ;;  %3021 = vmatpush.bf16.msra.mxu1 %v2952_v2  ;;  %v545_v18 = vrot.slane %v527_v12, 5  ;;  %v546_v19 = vrot.slane %v527_v12, 6  ;;  %v549_v23 = vrot.slane %v528_v20, 3  ;;  %v550_v25 = vrot.slane %v528_v20, 4 }
  0x3f   : > { %568 = vst [vmem:[#allocation1 + $0x4] ss:$9 sm:$0xff] %v537_v6  ;;  %v551_v27 = vrot.slane %v528_v20, 5  ;;  %v552_v28 = vrot.slane %v528_v20, 6  ;;  %v553_v29 = vrot.slane %v528_v20, 7  ;;  %v3584_v38 = vld [vmem:[%s4043_s2] sm:$0xff] }
  0x40   : > { %570 = vst [vmem:[#allocation1 + $0x5] ss:$9 sm:$0xff] %v538_v7  ;;  %v529_v30 = vld [vmem:[%s4041_s0 + $0x18] sm:$0x7f]  ;;  %v666_v41 = vld [vmem:[%s4043_s2 + $0x8] sm:$0xff] }
  0x41   : > { %572 = vst [vmem:[#allocation1 + $0x6] ss:$9 sm:$0xff] %v539_v8  ;;  %v554_v31 = vrot.slane %v529_v30, 1  ;;  %v555_v32 = vrot.slane %v529_v30, 2  ;;  %v556_v33 = vrot.slane %v529_v30, 3  ;;  %v557_v34 = vrot.slane %v529_v30, 4 }
  0x42   : > { %652 = vmatpush.bf16.msra.mxu0 %v2951_v9  ;;  %574 = vst [vmem:[#allocation1 + $0x7] ss:$9 sm:$0xff] %v540_v10  ;;  %3022 = vmatpush.bf16.msra.mxu1 %v2951_v9  ;;  %v558_v36 = vrot.slane %v529_v30, 5  ;;  %v559_v37 = vrot.slane %v529_v30, 6 }
  0x46   : > { %653 = vmatpush.bf16.msra.mxu0 %v2950_v11  ;;  %3023 = vmatpush.bf16.msra.mxu1 %v2950_v11 }
  0x49   : > { %v575_v16 = vld [vmem:[#allocation1] sm:$0xff] }
  0x4a   : > { %576 = vst [vmem:[#allocation1] ss:$9 sm:$0xff] %v527_v12 }
  0x4b   : > { %577 = vst [vmem:[#allocation1 + $0x1] ss:$9 sm:$0xff] %v541_v13 }
  0x4c   : > { %578 = vst [vmem:[#allocation1 + $0x2] ss:$9 sm:$0xff] %v542_v14 }
  0x4d   : > { %579 = vst [vmem:[#allocation1 + $0x3] ss:$9 sm:$0xff] %v543_v15 }
  0x4e   : > { %580 = vst [vmem:[#allocation1 + $0x4] ss:$9 sm:$0xff] %v544_v17 }
  0x4f   : > { %581 = vst [vmem:[#allocation1 + $0x5] ss:$9 sm:$0xff] %v545_v18 }
  0x50   : > { %582 = vst [vmem:[#allocation1 + $0x6] ss:$9 sm:$0xff] %v546_v19 }
  0x51   : > { %583 = vst [vmem:[#allocation1 + $0x7] ss:$9 sm:$0xff] %v528_v20 }
  0x58   : > { %v584_v24 = vld [vmem:[#allocation1] sm:$0xff] }
  0x59   : > { %v605_v26 = vpack.c.bf16 %v584_v24, %v575_v16  ;;  %585 = vst [vmem:[#allocation1] ss:$9 sm:$0xff] %v547_v21 }
  0x5a   : > { %586 = vst [vmem:[#allocation1 + $0x1] ss:$9 sm:$0xff] %v548_v22 }
  0x5b   : > { %2659 = vmatmul.msk.bf16.vlgmr.msra.gmra.mxu0 %vm639_vm0, %v605_v26  ;;  %587 = vst [vmem:[#allocation1 + $0x2] ss:$9 sm:$0xff] %v549_v23 }
  0x5c   : > { %588 = vst [vmem:[#allocation1 + $0x3] ss:$9 sm:$0xff] %v550_v25 }
  0x5d   : > { %589 = vst [vmem:[#allocation1 + $0x4] ss:$9 sm:$0xff] %v551_v27 }
  0x5e   : > { %590 = vst [vmem:[#allocation1 + $0x5] ss:$9 sm:$0xff] %v552_v28 }
  0x5f   : > { %591 = vst [vmem:[#allocation1 + $0x6] ss:$9 sm:$0xff] %v553_v29 }
  0x60   : > { %592 = vst [vmem:[#allocation1 + $0x7] ss:$9 sm:$0xff] %v529_v30 }
  0x67   : > { %v593_v35 = vld [vmem:[#allocation1] sm:$0xff] }
  0x68   : > { %594 = vst [vmem:[#allocation1] ss:$9 sm:$0xff] %v554_v31 }
  0x69   : > { %595 = vst [vmem:[#allocation1 + $0x1] ss:$9 sm:$0xff] %v555_v32 }
  0x6a   : > { %596 = vst [vmem:[#allocation1 + $0x2] ss:$9 sm:$0xff] %v556_v33 }
  0x6b   : > { %597 = vst [vmem:[#allocation1 + $0x3] ss:$9 sm:$0xff] %v557_v34 }
  0x6c   : > { %598 = vst [vmem:[#allocation1 + $0x4] ss:$9 sm:$0xff] %v558_v36 }
  0x6d   : > { %599 = vst [vmem:[#allocation1 + $0x5] ss:$9 sm:$0xff] %v559_v37 }
  0x74   : > { %v600_v39 = vld [vmem:[#allocation1] sm:$0xff] }
  0x75   : > { %v606_v40 = vpack.c.bf16 %v600_v39, %v593_v35  ;;  %725 = vst [vmem:[#allocation1] sm:$0xff] %v3584_v38 }
  0x77   : > { %2660 = vmatmul.msk.bf16.vlgmr.msra.gmra.mxu1 %vm639_vm0, %v606_v40 }
  0x7c   : > { %v727_v42 = vld [vmem:[#allocation1 + $0x1] ss:$9 sm:$0xff]  ;;  %v731_v44 = vld [vmem:[#allocation1 + $0x3] ss:$9 sm:$0xff] }
  0x7d   : > { %v729_v43 = vld [vmem:[#allocation1 + $0x2] ss:$9 sm:$0xff]  ;;  %v733_v45 = vld [vmem:[#allocation1 + $0x4] ss:$9 sm:$0xff] }
  0x7e   : > { %v735_v46 = vld [vmem:[#allocation1 + $0x5] ss:$9 sm:$0xff]  ;;  %v739_v48 = vld [vmem:[#allocation1 + $0x7] ss:$9 sm:$0xff] }
  0x7f   : > { %v737_v47 = vld [vmem:[#allocation1 + $0x6] ss:$9 sm:$0xff] }
  0x80   : > { %740 = vst [vmem:[#allocation1] sm:$0xff] %v666_v41 }
  0x87   : > { %v741_v49 = vld [vmem:[#allocation1] ss:$9 sm:$0xff]  ;;  %v743_v51 = vld [vmem:[#allocation1 + $0x2] ss:$9 sm:$0xff] }
  0x88   : > { %v742_v50 = vld [vmem:[#allocation1 + $0x1] ss:$9 sm:$0xff]  ;;  %v744_v52 = vld [vmem:[#allocation1 + $0x3] ss:$9 sm:$0xff] }
  0x89   : > { %v745_v53 = vld [vmem:[#allocation1 + $0x4] ss:$9 sm:$0xff]  ;;  %v747_v55 = vld [vmem:[#allocation1 + $0x6] ss:$9 sm:$0xff] }
  0x8a   : > { %v746_v54 = vld [vmem:[#allocation1 + $0x5] ss:$9 sm:$0xff]  ;;  %v748_v56 = vld [vmem:[#allocation1 + $0x7] ss:$9 sm:$0xff] }
  0x8b   : > { %749 = vst [vmem:[#allocation1] sm:$0xff] %v3584_v38 }
  0x92   : > { %v3592_v57 = vld [vmem:[#allocation1 + $0x1] ss:$9 sm:$0xff]  ;;  %v3596_v59 = vld [vmem:[#allocation1 + $0x3] ss:$9 sm:$0xff] }
  0x93   : > { %v3594_v58 = vld [vmem:[#allocation1 + $0x2] ss:$9 sm:$0xff]  ;;  %v3598_v60 = vld [vmem:[#allocation1 + $0x4] ss:$9 sm:$0xff] }
  0x94   : > { %v3600_v61 = vld [vmem:[#allocation1 + $0x5] ss:$9 sm:$0xff]  ;;  %v3604_v63 = vld [vmem:[#allocation1 + $0x7] ss:$9 sm:$0xff] }
  0x95   : > { %v3602_v62 = vld [vmem:[#allocation1 + $0x6] ss:$9 sm:$0xff] }
  0x96   : > { %757 = vst [vmem:[#allocation1] sm:$0xff] %v666_v41 }
  0x9d   : > { %v3606_v5 = vld [vmem:[#allocation1 + $0x1] ss:$9 sm:$0xff]  ;;  %v3610_v13 = vld [vmem:[#allocation1 + $0x3] ss:$9 sm:$0xff] }
  0x9e   : > { %v3608_v9 = vld [vmem:[#allocation1 + $0x2] ss:$9 sm:$0xff]  ;;  %v3612_v15 = vld [vmem:[#allocation1 + $0x4] ss:$9 sm:$0xff] }
  0x9f   : > { %v3614_v17 = vld [vmem:[#allocation1 + $0x5] ss:$9 sm:$0xff]  ;;  %v3618_v20 = vld [vmem:[#allocation1 + $0x7] ss:$9 sm:$0xff] }
  0xa0   : > { %v3616_v19 = vld [vmem:[#allocation1 + $0x6] ss:$9 sm:$0xff]  ;;  %v758_v27 = vld [vmem:[#allocation1] ss:$9 sm:$0xff] }
  0xd8   : > { %v655_v0 = vpop.f32.mrf.mxu0 }
  0xd9   : > { %v671_v1 = vrot.slane %v655_v0, 1  ;;  %v672_v2 = vrot.slane %v655_v0, 2  ;;  %v673_v3 = vrot.slane %v655_v0, 3  ;;  %v674_v4 = vrot.slane %v655_v0, 4 }
  0xda   : > { %v675_v6 = vrot.slane %v655_v0, 5  ;;  %v676_v7 = vrot.slane %v655_v0, 6  ;;  %v796_v8 = vadd.f32 %v727_v42, %v655_v0  ;;  %v677_v22 = vrot.slane %v655_v0, 7 }
  0xdb   : > { %v797_v10 = vadd.f32 %v729_v43, %v671_v1  ;;  %v798_v11 = vadd.f32 %v731_v44, %v672_v2  ;;  %v799_v12 = vadd.f32 %v733_v45, %v673_v3  ;;  %v800_v14 = vadd.f32 %v735_v46, %v674_v4 }
  0xdc   : > { %857 = vst [vmem:[#allocation1 + $0x1] ss:$9 sm:$0xff] %v796_v8  ;;  %v801_v16 = vadd.f32 %v737_v47, %v675_v6  ;;  %v802_v18 = vadd.f32 %v739_v48, %v676_v7  ;;  %v803_v28 = vadd.f32 %v741_v49, %v677_v22 }
  0xdd   : > { %859 = vst [vmem:[#allocation1 + $0x2] ss:$9 sm:$0xff] %v797_v10 }
  0xde   : > { %861 = vst [vmem:[#allocation1 + $0x3] ss:$9 sm:$0xff] %v798_v11 }
  0xdf   : > { %863 = vst [vmem:[#allocation1 + $0x4] ss:$9 sm:$0xff] %v799_v12 }
  0xe0   : > { %865 = vst [vmem:[#allocation1 + $0x5] ss:$9 sm:$0xff] %v800_v14  ;;  %v657_v21 = vpop.f32.mrf.mxu0 }
  0xe1   : > { %867 = vst [vmem:[#allocation1 + $0x6] ss:$9 sm:$0xff] %v801_v16  ;;  %v678_v23 = vrot.slane %v657_v21, 1  ;;  %v679_v24 = vrot.slane %v657_v21, 2  ;;  %v680_v25 = vrot.slane %v657_v21, 3  ;;  %v681_v26 = vrot.slane %v657_v21, 4 }
  0xe2   : > { %869 = vst [vmem:[#allocation1 + $0x7] ss:$9 sm:$0xff] %v802_v18  ;;  %v682_v29 = vrot.slane %v657_v21, 5  ;;  %v683_v31 = vrot.slane %v657_v21, 6  ;;  %v804_v32 = vadd.f32 %v742_v50, %v657_v21  ;;  %v684_v41 = vrot.slane %v657_v21, 7 }
  0xe3   : > { %v805_v30 = vadd.f32 %v743_v51, %v678_v23  ;;  %v806_v33 = vadd.f32 %v744_v52, %v679_v24  ;;  %v807_v35 = vadd.f32 %v745_v53, %v680_v25  ;;  %v808_v36 = vadd.f32 %v746_v54, %v681_v26 }
  0xe4   : > { %v809_v37 = vadd.f32 %v747_v55, %v682_v29  ;;  %v810_v39 = vadd.f32 %v748_v56, %v683_v31  ;;  %v811_v47 = vadd.f32 %v3592_v57, %v684_v41 }
  0xe9   : > { %v870_v34 = vld [vmem:[#allocation1] sm:$0xff] }
  0xea   : > { %871 = vst [vmem:[#allocation1] ss:$9 sm:$0xff] %v803_v28  ;;  %v902_v40 = vsel %vm901_vm1, %v3584_v38, %v870_v34 }
  0xeb   : > { %872 = vst [vmem:[#allocation1 + $0x1] ss:$9 sm:$0xff] %v804_v32 }
  0xec   : > { %873 = vst [vmem:[#allocation1 + $0x2] ss:$9 sm:$0xff] %v805_v30 }
  0xed   : > { %874 = vst [vmem:[#allocation1 + $0x3] ss:$9 sm:$0xff] %v806_v33 }
  0xee   : > { %875 = vst [vmem:[#allocation1 + $0x4] ss:$9 sm:$0xff] %v807_v35 }
  0xef   : > { %876 = vst [vmem:[#allocation1 + $0x5] ss:$9 sm:$0xff] %v808_v36 }
  0xf0   : > { %877 = vst [vmem:[#allocation1 + $0x6] ss:$9 sm:$0xff] %v809_v37 }
  0xf1   : > { %878 = vst [vmem:[#allocation1 + $0x7] ss:$9 sm:$0xff] %v810_v39 }
  0xf2   : > { %904 = vst [vmem:[#allocation2 + $0x10] sm:$0xff] %v902_v40 }
  0xf4   : > { %v660_v42 = vpop.f32.mrf.mxu1 }
  0xf5   : > { %v685_v43 = vrot.slane %v660_v42, 1  ;;  %v686_v44 = vrot.slane %v660_v42, 2  ;;  %v687_v45 = vrot.slane %v660_v42, 3  ;;  %v688_v46 = vrot.slane %v660_v42, 4 }
  0xf6   : > { %v689_v48 = vrot.slane %v660_v42, 5  ;;  %v812_v50 = vadd.f32 %v3594_v58, %v660_v42  ;;  %v690_v57 = vrot.slane %v660_v42, 6  ;;  %v691_v58 = vrot.slane %v660_v42, 7 }
  0xf7   : > { %v813_v49 = vadd.f32 %v3596_v59, %v685_v43  ;;  %v814_v51 = vadd.f32 %v3598_v60, %v686_v44  ;;  %v815_v53 = vadd.f32 %v3600_v61, %v687_v45  ;;  %v816_v54 = vadd.f32 %v3602_v62, %v688_v46 }
  0xf8   : > { %v879_v52 = vld [vmem:[#allocation1] sm:$0xff]  ;;  %v817_v55 = vadd.f32 %v3604_v63, %v689_v48  ;;  %v818_v1 = vadd.f32 %v758_v27, %v690_v57  ;;  %v819_v2 = vadd.f32 %v3606_v5, %v691_v58 }
  0xf9   : > { %880 = vst [vmem:[#allocation1 + $0x1] ss:$9 sm:$0xff] %v811_v47 }
  0xfa   : > { %881 = vst [vmem:[#allocation1 + $0x2] ss:$9 sm:$0xff] %v812_v50 }
  0xfb   : > { %882 = vst [vmem:[#allocation1 + $0x3] ss:$9 sm:$0xff] %v813_v49 }
  0xfc   : > { %883 = vst [vmem:[#allocation1 + $0x4] ss:$9 sm:$0xff] %v814_v51  ;;  %v662_v56 = vpop.f32.mrf.mxu1 }
  0xfd   : > { %884 = vst [vmem:[#allocation1 + $0x5] ss:$9 sm:$0xff] %v815_v53  ;;  %v692_v59 = vrot.slane %v662_v56, 1  ;;  %v693_v60 = vrot.slane %v662_v56, 2  ;;  %v694_v0 = vrot.slane %v662_v56, 3  ;;  %v695_v61 = vrot.slane %v662_v56, 4 }
  0xfe   : > { %885 = vst [vmem:[#allocation1 + $0x6] ss:$9 sm:$0xff] %v816_v54  ;;  %v696_v62 = vrot.slane %v662_v56, 5  ;;  %v820_v4 = vadd.f32 %v3608_v9, %v662_v56 }
  0xff   : > { %886 = vst [vmem:[#allocation1 + $0x7] ss:$9 sm:$0xff] %v817_v55  ;;  %v821_v3 = vadd.f32 %v3610_v13, %v692_v59  ;;  %v822_v6 = vadd.f32 %v3612_v15, %v693_v60  ;;  %v823_v7 = vadd.f32 %v3614_v17, %v694_v0  ;;  %v824_v8 = vadd.f32 %v3616_v19, %v695_v61 }
 0x100   : > { %905 = vst [vmem:[#allocation2] sm:$0xff] %v879_v52  ;;  %v825_v10 = vadd.f32 %v3618_v20, %v696_v62 }
 0x106   : > { %v887_v63 = vld [vmem:[#allocation1] sm:$0xff] }
 0x107   : > { %888 = vst [vmem:[#allocation1] ss:$9 sm:$0xff] %v818_v1  ;;  %v903_v5 = vsel %vm901_vm1, %v3584_v38, %v887_v63 }
 0x108   : > { %889 = vst [vmem:[#allocation1 + $0x1] ss:$9 sm:$0xff] %v819_v2 }
 0x109   : > { %890 = vst [vmem:[#allocation1 + $0x2] ss:$9 sm:$0xff] %v820_v4 }
 0x10a   : > { %891 = vst [vmem:[#allocation1 + $0x3] ss:$9 sm:$0xff] %v821_v3 }
 0x10b   : > { %892 = vst [vmem:[#allocation1 + $0x4] ss:$9 sm:$0xff] %v822_v6 }
 0x10c   : > { %893 = vst [vmem:[#allocation1 + $0x5] ss:$9 sm:$0xff] %v823_v7 }
 0x10d   : > { %894 = vst [vmem:[#allocation1 + $0x6] ss:$9 sm:$0xff] %v824_v8 }
 0x10e   : > { %895 = vst [vmem:[#allocation1 + $0x7] ss:$9 sm:$0xff] %v825_v10 }
 0x10f   : > { %906 = vst [vmem:[#allocation2 + $0x18] sm:$0xff] %v903_v5 }
 0x115   : > { %v896_v9 = vld [vmem:[#allocation1] sm:$0xff] }
 0x116   : > { %907 = vst [vmem:[#allocation2 + $0x8] sm:$0xff] %v896_v9 }
 0x117 PF: > { %v2747_v11 = vld [vmem:[%s3523_s9 + $0xa8] sm:$0xf]  ;;  %v2976_v12 = vld [vmem:[%s3523_s9 + $0xb0] sm:$0xf0]  ;;  %v2975_v38 = vld [vmem:[%s3523_s9 + $0xac] sm:$0xf] }
 0x118   : > { %v2748_v13 = vor.u32 %v2976_v12, %v2747_v11  ;;  %v2749_v14 = vld [vmem:[%s3523_s9 + $0xb4] sm:$0xf0]  ;;  %v2735_v15 = vld [vmem:[%s3523_s9 + $0x90] sm:$0xf]  ;;  %v2973_v16 = vld [vmem:[%s3523_s9 + $0x98] sm:$0xf0] }
 0x119   : > { %v2752_v17 = vor.u32 %v2975_v38, %v2749_v14  ;;  %v2972_v18 = vld [vmem:[%s3523_s9 + $0x94] sm:$0xf]  ;;  %v2737_v19 = vld [vmem:[%s3523_s9 + $0x9c] sm:$0xf0]  ;;  %v2736_v20 = vor.u32 %v2973_v16, %v2735_v15  ;;  %v2723_v22 = vld [vmem:[%s3523_s9 + $0x78] sm:$0xf] }
 0x11a   : > { %1076 = vmatpush.bf16.msra.mxu0 %v2748_v13  ;;  %v2740_v21 = vor.u32 %v2972_v18, %v2737_v19  ;;  %v2970_v23 = vld [vmem:[%s3523_s9 + $0x80] sm:$0xf0]  ;;  %v2969_v24 = vld [vmem:[%s3523_s9 + $0x7c] sm:$0xf]  ;;  %v2725_v25 = vld [vmem:[%s3523_s9 + $0x84] sm:$0xf0] }
 0x11b   : > { %1095 = vmatpush.bf16.msra.mxu1 %v2752_v17  ;;  %v2724_v26 = vor.u32 %v2970_v23, %v2723_v22  ;;  %v2728_v27 = vor.u32 %v2969_v24, %v2725_v25  ;;  %v2711_v28 = vld [vmem:[%s3523_s9 + $0x60] sm:$0xf]  ;;  %v2967_v29 = vld [vmem:[%s3523_s9 + $0x68] sm:$0xf0]  ;;  %v2966_v30 = vld [vmem:[%s3523_s9 + $0x64] sm:$0xf] }
 0x11c   : > { %v2713_v31 = vld [vmem:[%s3523_s9 + $0x6c] sm:$0xf0]  ;;  %v2712_v32 = vor.u32 %v2967_v29, %v2711_v28  ;;  %v2699_v33 = vld [vmem:[%s3523_s9 + $0x48] sm:$0xf]  ;;  %v2977_v35 = vld [vmem:[%s3523_s9 + $0xb8] sm:$0xf0] }
 0x11d   : > { %v2755_v34 = vld [vmem:[%s3523_s9 + $0xb0] sm:$0xf]  ;;  %v2716_v36 = vor.u32 %v2966_v30, %v2713_v31  ;;  %v2964_v37 = vld [vmem:[%s3523_s9 + $0x50] sm:$0xf0]  ;;  %v2743_v40 = vld [vmem:[%s3523_s9 + $0x98] sm:$0xf] }
 0x11e   : > { %1077 = vmatpush.bf16.msra.mxu0 %v2736_v20  ;;  %v2756_v39 = vor.u32 %v2977_v35, %v2755_v34  ;;  %v2974_v41 = vld [vmem:[%s3523_s9 + $0xa0] sm:$0xf0]  ;;  %v2963_v42 = vld [vmem:[%s3523_s9 + $0x4c] sm:$0xf]  ;;  %v2701_v43 = vld [vmem:[%s3523_s9 + $0x54] sm:$0xf0]  ;;  %v2700_v45 = vor.u32 %v2964_v37, %v2699_v33 }
 0x11f   : > { %1096 = vmatpush.bf16.msra.mxu1 %v2740_v21  ;;  %v2744_v44 = vor.u32 %v2974_v41, %v2743_v40  ;;  %v2731_v46 = vld [vmem:[%s3523_s9 + $0x80] sm:$0xf]  ;;  %v2971_v47 = vld [vmem:[%s3523_s9 + $0x88] sm:$0xf0]  ;;  %v2704_v48 = vor.u32 %v2963_v42, %v2701_v43  ;;  %v2687_v49 = vld [vmem:[%s3523_s9 + $0x30] sm:$0xf] }
 0x120   : > { %1114 = vmatpush.bf16.msra.mxu2 %v2756_v39  ;;  %v2961_v50 = vld [vmem:[%s3523_s9 + $0x38] sm:$0xf0]  ;;  %v2960_v51 = vld [vmem:[%s3523_s9 + $0x34] sm:$0xf]  ;;  %v2689_v52 = vld [vmem:[%s3523_s9 + $0x3c] sm:$0xf0]  ;;  %v2732_v53 = vor.u32 %v2971_v47, %v2731_v46 }
 0x121   : > { %v2688_v54 = vor.u32 %v2961_v50, %v2687_v49  ;;  %v2719_v55 = vld [vmem:[%s3523_s9 + $0x68] sm:$0xf]  ;;  %v2968_v56 = vld [vmem:[%s3523_s9 + $0x70] sm:$0xf0]  ;;  %v2692_v57 = vor.u32 %v2960_v51, %v2689_v52  ;;  %v2675_v58 = vld [vmem:[%s3523_s9 + $0x18] sm:$0xf] }
 0x122   : > { %1078 = vmatpush.bf16.msra.mxu0 %v2724_v26  ;;  %v2958_v59 = vld [vmem:[%s3523_s9 + $0x20] sm:$0xf0]  ;;  %v2957_v60 = vld [vmem:[%s3523_s9 + $0x1c] sm:$0xf]  ;;  %v2677_v0 = vld [vmem:[%s3523_s9 + $0x24] sm:$0xf0]  ;;  %v2720_v1 = vor.u32 %v2968_v56, %v2719_v55 }
 0x123   : > { %1097 = vmatpush.bf16.msra.mxu1 %v2728_v27  ;;  %v2676_v61 = vor.u32 %v2958_v59, %v2675_v58  ;;  %v2707_v2 = vld [vmem:[%s3523_s9 + $0x50] sm:$0xf]  ;;  %v2965_v62 = vld [vmem:[%s3523_s9 + $0x58] sm:$0xf0]  ;;  %v2680_v3 = vor.u32 %v2957_v60, %v2677_v0  ;;  %v2663_v63 = vld [vmem:[%s3523_s9] sm:$0xf] }
 0x124   : > { %1115 = vmatpush.bf16.msra.mxu2 %v2744_v44  ;;  %v2955_v4 = vld [vmem:[%s3523_s9 + $0x8] sm:$0xf0]  ;;  %v2954_v6 = vld [vmem:[%s3523_s9 + $0x4] sm:$0xf]  ;;  %v2665_v7 = vld [vmem:[%s3523_s9 + $0xc] sm:$0xf0]  ;;  %v2708_v10 = vor.u32 %v2965_v62, %v2707_v2 }
 0x125   : > { %v3680_v8 = vld [vmem:[#allocation2 + $0x10] sm:$0xff]  ;;  %v2664_v5 = vor.u32 %v2955_v4, %v2663_v63  ;;  %v3682_v9 = vld [vmem:[#allocation2] sm:$0xff]  ;;  %v2695_v11 = vld [vmem:[%s3523_s9 + $0x38] sm:$0xf]  ;;  %v2668_v38 = vor.u32 %v2954_v6, %v2665_v7  ;;  %vm1169_vm2 = vcmask 261120   ;;  %s3378_s22 = smov 96  }
 0x126   : > { %1079 = vmatpush.bf16.msra.mxu0 %v2712_v32  ;;  %v2962_v12 = vld [vmem:[%s3523_s9 + $0x40] sm:$0xf0]  ;;  %v912_v13 = vpack.c.bf16 %v3682_v9, %v3680_v8  ;;  %v2683_v15 = vld [vmem:[%s3523_s9 + $0x20] sm:$0xf]  ;;  %v2959_v16 = vld [vmem:[%s3523_s9 + $0x28] sm:$0xf0] }
 0x127   : > { %1098 = vmatpush.bf16.msra.mxu1 %v2716_v36  ;;  %v2696_v14 = vor.u32 %v2962_v12, %v2695_v11  ;;  %v2684_v17 = vor.u32 %v2959_v16, %v2683_v15  ;;  %v2671_v18 = vld [vmem:[%s3523_s9 + $0x8] sm:$0xf]  ;;  %v2956_v19 = vld [vmem:[%s3523_s9 + $0x10] sm:$0xf0]  ;;  %v3694_v22 = vld [vmem:[#allocation2 + $0x8] sm:$0xff]  ;;  %s3377_s9 = smov 32  }
 0x128   : > { %1116 = vmatpush.bf16.msra.mxu2 %v2732_v53  ;;  %v2672_v20 = vor.u32 %v2956_v19, %v2671_v18  ;;  %v3692_v21 = vld [vmem:[#allocation2 + $0x18] sm:$0xff]  ;;  %s3379_s23 = smov 64   ;;  %vm1192_vm3 = vcmask 130048   ;;  %vm1480_vm4 = vcmask 523264   ;;  %vm1483_vm5 = vcmask 785408   ;;  %p2941_p1 = scmp.ne.s32.totalorder %s3361_s12, 2 }
 0x129   : > { %v913_v23 = vpack.c.bf16 %v3694_v22, %v3692_v21  ;;  %v3699_v25 = vld [vmem:[%s3551_s20] sm:$0xff] }
 0x12a   : > { %1080 = vmatpush.bf16.msra.mxu0 %v2700_v45  ;;  %v1142_v27 = vperm.slane %v3699_v25, 1  ;;  %v1133_v31 = vperm.slane %v3699_v25, 0  ;;  %v1151_v51 = vperm.slane %v3699_v25, 2 }
 0x12b   : > { %1099 = vmatpush.bf16.msra.mxu1 %v2704_v48 }
 0x12c   : > { %1117 = vmatpush.bf16.msra.mxu2 %v2720_v1 }
 0x12e   : > { %1081 = vmatpush.bf16.msra.mxu0 %v2688_v54 }
 0x12f   : > { %1100 = vmatpush.bf16.msra.mxu1 %v2692_v57 }
 0x130   : > { %1118 = vmatpush.bf16.msra.mxu2 %v2708_v10 }
 0x132   : > { %1082 = vmatpush.bf16.msra.mxu0 %v2676_v61 }
 0x133   : > { %1101 = vmatpush.bf16.msra.mxu1 %v2680_v3 }
 0x134   : > { %1119 = vmatpush.bf16.msra.mxu2 %v2696_v14 }
 0x136   : > { %1083 = vmatpush.bf16.msra.mxu0 %v2664_v5 }
 0x137   : > { %1102 = vmatpush.bf16.msra.mxu1 %v2668_v38 }
 0x138   : > { %1120 = vmatpush.bf16.msra.mxu2 %v2684_v17 }
 0x139   : > { %1084 = vmatmul.bf16.vlgmr.msra.gmra.mxu0 %v912_v13 }
 0x13a   : > { %1103 = vmatmul.bf16.vlgmr.msra.gmra.mxu1 %v912_v13 }
 0x13c   : > { %1121 = vmatpush.bf16.msra.mxu2 %v2672_v20 }
 0x13f   : > { %1122 = vmatmul.bf16.vlgmr.msra.gmra.mxu2 %v912_v13 }
 0x149   : > { %1089 = vmatmul.bf16.gmra.mxu0 %v913_v23 }
 0x14a   : > { %1108 = vmatmul.bf16.gmra.mxu1 %v913_v23 }
 0x14f   : > { %1127 = vmatmul.bf16.gmra.mxu2 %v913_v23 }
 0x1b6   : > { %v1085_v26 = vpop.f32.mrf.mxu0 }
 0x1b7   : > { %v1104_v24 = vpop.f32.mrf.mxu1  ;;  %v1134_v35 = vadd.f32 %v1133_v31, %v1085_v26 }
 0x1b8   : > { %v1143_v29 = vadd.f32 %v1142_v27, %v1104_v24 }
 0x1be   : > { %v1087_v33 = vpop.f32.mrf.mxu0 }
 0x1bf   : > { %v1106_v28 = vpop.f32.mrf.mxu1  ;;  %v1135_v36 = vadd.f32 %v1133_v31, %v1087_v33 }
 0x1c0   : > { %v1144_v30 = vadd.f32 %v1142_v27, %v1106_v28 }
 0x1c1   : > { %v1166_v39 = vpack.c.bf16 %v1135_v36, %v1134_v35 }
 0x1c2   : > { %v1167_v32 = vpack.c.bf16 %v1144_v30, %v1143_v29  ;;  %v1123_v50 = vpop.f32.mrf.mxu2 }
 0x1c3   : > { %v1152_v52 = vadd.f32 %v1151_v51, %v1123_v50 }
 0x1c4   : > { %1382 = vrot.lane.b32.xlu2 %v1167_v32, %s3377_s9  ;;  %1239 = vrot.lane.b32.xlu1 %v1167_v32, %s3378_s22  ;;  %v1174_v34 = vsel %vm1169_vm2, %v1167_v32, 0 }
 0x1c5   : > { %1183 = vmatpush.bf16.xpose.msra.mxu3 %v1174_v34 }
 0x1c6   : > { %v1090_v44 = vpop.f32.mrf.mxu0 }
 0x1c7   : > { %v1109_v37 = vpop.f32.mrf.mxu1  ;;  %v1136_v46 = vadd.f32 %v1133_v31, %v1090_v44 }
 0x1c8   : > { %v1145_v40 = vadd.f32 %v1142_v27, %v1109_v37 }
 0x1ca   : > { %v1125_v53 = vpop.f32.mrf.mxu2 }
 0x1cb   : > { %v1153_v54 = vadd.f32 %v1151_v51, %v1125_v53 }
 0x1cc   : > { %1380 = vrot.lane.b32.xlu2 %v1166_v39, %s3377_s9  ;;  %1236 = vrot.lane.b32.xlu1 %v1166_v39, %s3378_s22 }
 0x1cd   : > { %2757 = vmatmul.msk.bf16.vlgmr.msra.gmra.mxu3 %vm1169_vm2, %v1166_v39  ;;  %v1168_v55 = vpack.c.bf16 %v1153_v54, %v1152_v52 }
 0x1ce   : > { %v1092_v47 = vpop.f32.mrf.mxu0 }
 0x1cf   : > { %v1111_v41 = vpop.f32.mrf.mxu1  ;;  %v1137_v48 = vadd.f32 %v1133_v31, %v1092_v47  ;;  %1222 = vmatpush.bf16.msrb.mxu3 %v1168_v55 }
 0x1d0   : > { %v1146_v42 = vadd.f32 %v1142_v27, %v1111_v41 }
 0x1d1   : > { %v1501_v49 = vpack.c.bf16 %v1137_v48, %v1136_v46 }
 0x1d2   : > { %v1502_v43 = vpack.c.bf16 %v1146_v42, %v1145_v40  ;;  %v1128_v7 = vpop.f32.mrf.mxu2 }
 0x1d3   : > { %v1154_v27 = vadd.f32 %v1151_v51, %v1128_v7 }
 0x1d4   : > { %1309 = vrot.lane.b32.xlu2 %v1166_v39, %s3379_s23  ;;  %1572 = vrot.lane.b32.xlu1 %v1502_v43, %s3378_s22  ;;  %v1508_v45 = vsel %vm1169_vm2, %v1502_v43, 0 }
 0x1d5   : > { %1517 = vmatpush.bf16.xpose.msrb.mxu0 %v1508_v45 }
 0x1da   : > { %v1130_v10 = vpop.f32.mrf.mxu2 }
 0x1db   : > { %v1155_v28 = vadd.f32 %v1151_v51, %v1130_v10 }
 0x1dc   : > { %1715 = vrot.lane.b32.xlu2 %v1502_v43, %s3377_s9  ;;  %2765 = vmatmul.msk.bf16.vlgmr.msrb.gmra.mxu0 %vm1169_vm2, %v1501_v49 }
 0x1dd   : > { %1569 = vrot.lane.b32.xlu1 %v1501_v49, %s3378_s22  ;;  %v3744_v30 = vpack.c.bf16 %v1155_v28, %v1154_v27 }
 0x1e4   : > { %1644 = vrot.lane.b32.xlu2 %v1502_v43, %s3379_s23 }
 0x1e5   : > { %1713 = vrot.lane.b32.xlu1 %v1501_v49, %s3377_s9 }
 0x1ed   : > { %1425 = vrot.lane.b32.xlu1 %v1168_v55, %s3377_s9 }
 0x21e   : > { %v1383_v56 = vpop.permute.xlu2 %1382 }
 0x21f   : > { %v1388_v57 = vsel %vm1169_vm2, %v1383_v56, 0 }
 0x220   : > { %1397 = vmatpush.bf16.xpose.msrb.mxu2 %v1388_v57 }
 0x226   : > { %v1381_v58 = vpop.permute.xlu2 %1380 }
 0x227   : > { %2763 = vmatmul.msk.bf16.vlgmr.msrb.gmra.mxu2 %vm1169_vm2, %v1381_v58 }
 0x22e   : > { %v1310_v5 = vpop.permute.xlu2 %1309 }
 0x236   : > { %v1240_v59 = vpop.permute.xlu1 %1239  ;;  %v1716_v38 = vpop.permute.xlu2 %1715 }
 0x237   : > { %v1245_v60 = vsel %vm1169_vm2, %v1240_v59, 0  ;;  %v1721_v18 = vsel %vm1169_vm2, %v1716_v38, 0 }
 0x238   : > { %1254 = vmatpush.bf16.xpose.msra.mxu3 %v1245_v60 }
 0x23e   : > { %v1237_v12 = vpop.permute.xlu1 %1236  ;;  %v1645_v20 = vpop.permute.xlu2 %1644 }
 0x23f   : > { %v1650_v23 = vsel %vm1169_vm2, %v1645_v20, 0 }
 0x240   : > { %1659 = vmatpush.bf16.xpose.msra.mxu0 %v1650_v23 }
 0x246   : > { %v1573_v17 = vpop.permute.xlu1 %1572 }
 0x247   : > { %v1578_v19 = vsel %vm1169_vm2, %v1573_v17, 0 }
 0x248   : > { %1587 = vmatpush.bf16.xpose.msra.mxu2 %v1578_v19 }
 0x24f   : > { %v1570_v26 = vpop.permute.xlu1 %1569 }
 0x250   : > { %v1185_v0 = vpop.f32.mrf.mxu3  ;;  %1730 = vmatpush.bf16.xpose.msrb.mxu2 %v1721_v18 }
 0x251   : > { %v1190_v1 = vmul.f32 0.17677669, %v1185_v0  ;;  %2767 = vmatmul.msk.bf16.vlgmr.msra.gmra.mxu2 %vm1169_vm2, %v1570_v26 }
 0x253   : > { %v1193_v61 = vsel %vm1192_vm3, %v1190_v1, -inf }
 0x254   : > { %1194 = vmax.xlane.f32.xlu0 %v1193_v61 }
 0x258   : > { %v1187_v2 = vpop.f32.mrf.mxu3 }
 0x259   : > { %v1191_v62 = vmul.f32 0.17677669, %v1187_v2  ;;  %v1519_v63 = vpop.f32.mrf.mxu0 }
 0x25a   : > { %v3724_v4 = vmul.f32 0.17677669, %v1519_v63 }
 0x25b   : > { %v1196_v3 = vsel %vm1192_vm3, %v1191_v62, -inf }
 0x25c   : > { %1197 = vmax.xlane.f32.xlu0 %v1196_v3  ;;  %v1526_v6 = vsel %vm1192_vm3, %v3724_v4, -inf }
 0x25d   : > { %1527 = vmax.xlane.f32.xlu2 %v1526_v6 }
 0x261   : > { %v1521_v14 = vpop.f32.mrf.mxu0 }
 0x262   : > { %v3736_v16 = vmul.f32 0.17677669, %v1521_v14 }
 0x264   : > { %v1529_v24 = vsel %vm1192_vm3, %v3736_v16, -inf }
 0x270   : > { %1311 = vrot.lane.b32.xlu0 %v1167_v32, %s3379_s23  ;;  %v1714_v32 = vpop.permute.xlu1 %1713 }
 0x271   : > { %2771 = vmatmul.msk.bf16.vlgmr.msrb.gmra.mxu2 %vm1169_vm2, %v1714_v32 }
 0x278   : > { %1642 = vrot.lane.b32.xlu0 %v1501_v49, %s3379_s23  ;;  %v1426_v46 = vpop.permute.xlu1 %1425 }
 0x280   : > { %1283 = vrot.lane.b32.xlu0 %v1168_v55, %s3378_s22 }
 0x288   : > { %1354 = vrot.lane.b32.xlu0 %v1168_v55, %s3379_s23 }
 0x2aa   : > { %v1399_v11 = vpop.f32.mrf.mxu2 }
 0x2ab   : > { %v3732_v13 = vmul.f32 0.17677669, %v1399_v11 }
 0x2ad   : > { %v1406_v15 = vsel %vm1192_vm3, %v3732_v13, -inf }
 0x2b2   : > { %1407 = vmax.xlane.f32.xlu0 %v1406_v15  ;;  %v1401_v58 = vpop.f32.mrf.mxu2 }
 0x2b3   : > { %v1405_v59 = vmul.f32 0.17677669, %v1401_v58 }
 0x2b5   : > { %v1409_v60 = vsel %vm1192_vm3, %v1405_v59, -inf }
 0x2ba   : > { %1530 = vmax.xlane.f32.xlu0 %v1529_v24 }
 0x2c7   : > { %v1195_v29 = vpop.xlane.xlu0 %1194 }
 0x2c8   : > { %v1199_v31 = vsub.f32 %v1190_v1, %v1195_v29 }
 0x2ca   : > { %v1201_v33 = vmul.f32 1.442695, %v1199_v31 }
 0x2cc   : > { %3110 = vpow2.f32 %v1201_v33 }
 0x2ce   : > { %1687 = vrot.lane.b32.xlu0 %v3744_v30, %s3379_s23 }
 0x2cf   : > { %v1198_v34 = vpop.xlane.xlu0 %1197 }
 0x2d0   : > { %v1200_v35 = vsub.f32 %v1191_v62, %v1198_v34  ;;  %v1528_v24 = vpop.xlane.xlu2 %1527 }
 0x2d2   : > { %v1203_v36 = vmul.f32 1.442695, %v1200_v35  ;;  %v3749_v37 = vpop.eup %3110 }
 0x2d4   : > { %3112 = vpow2.f32 %v1203_v36  ;;  %v1589_v0 = vpop.f32.mrf.mxu2 }
 0x2d5   : > { %v3772_v1 = vmul.f32 0.17677669, %v1589_v0 }
 0x2d7   : > { %v1596_v61 = vsel %vm1192_vm3, %v3772_v1, -inf }
 0x2da   : > { %v3751_v39 = vpop.eup %3112 }
 0x2db   : > { %v1211_v40 = vpack.c.bf16 %v3751_v39, %v3749_v37 }
 0x2dc   : > { %v1591_v2 = vpop.f32.mrf.mxu2 }
 0x2dd   : > { %2758 = vmatmul.msk.bf16.vlgmr.msrb.gmra.mxu3 %vm1192_vm3, %v1211_v40  ;;  %v3776_v62 = vmul.f32 0.17677669, %v1591_v2 }
 0x2df   : > { %v1599_v3 = vsel %vm1192_vm3, %v3776_v62, -inf }
 0x2e2   : > { %v1312_v41 = vpop.permute.xlu0 %1311 }
 0x2e3   : > { %v1317_v42 = vsel %vm1169_vm2, %v1312_v41, 0 }
 0x2e4   : > { %1326 = vmatpush.bf16.xpose.msrb.mxu1 %v1317_v42 }
 0x2ea   : > { %v1643_v43 = vpop.permute.xlu0 %1642 }
 0x2eb   : > { %2761 = vmatmul.msk.bf16.vlgmr.msrb.gmra.mxu1 %vm1169_vm2, %v1310_v5  ;;  %2769 = vmatmul.msk.bf16.vlgmr.msra.gmra.mxu0 %vm1169_vm2, %v1643_v43 }
 0x2ed   : > { %2759 = vmatmul.msk.bf16.vlgmr.msra.gmra.mxu3 %vm1169_vm2, %v1237_v12 }
 0x2f2   : > { %v1284_v44 = vpop.permute.xlu0 %1283 }
 0x2f3   : > { %1296 = vmatpush.bf16.msrb.mxu3 %v1284_v44 }
 0x2f4   : > { %v1732_v10 = vpop.f32.mrf.mxu2 }
 0x2f5   : > { %v3786_v5 = vmul.f32 0.17677669, %v1732_v10 }
 0x2f7   : > { %1438 = vmatpush.bf16.msra.mxu3 %v1426_v46  ;;  %v1739_v12 = vsel %vm1192_vm3, %v3786_v5, -inf }
 0x2fa   : > { %v1355_v45 = vpop.permute.xlu0 %1354 }
 0x2fb   : > { %1367 = vmatpush.bf16.msra.mxu1 %v1355_v45 }
 0x2fc   : > { %v1734_v19 = vpop.f32.mrf.mxu2 }
 0x2fd   : > { %v3798_v20 = vmul.f32 0.17677669, %v1734_v19 }
 0x2ff   : > { %1555 = vmatpush.bf16.msrb.mxu1 %v3744_v30  ;;  %v1742_v23 = vsel %vm1192_vm3, %v3798_v20, -inf }
 0x325   : > { %v1408_v26 = vpop.xlane.xlu0 %1407 }
 0x326   : > { %v1412_v29 = vsub.f32 %v3732_v13, %v1408_v26 }
 0x328   : > { %v1414_v32 = vmul.f32 1.442695, %v1412_v29 }
 0x32d   : > { %v1531_v41 = vpop.xlane.xlu0 %1530 }
 0x32e   : > { %v1533_v13 = vsub.f32 %v3736_v16, %v1531_v41 }
 0x360   : > { %v3761_v47 = vpop.f32.mrf.mxu3 }
 0x368   : > { %v3763_v48 = vpop.f32.mrf.mxu3  ;;  %v1328_v49 = vpop.f32.mrf.mxu1 }
 0x369   : > { %v1333_v50 = vmul.f32 0.17677669, %v1328_v49  ;;  %v1661_v11 = vpop.f32.mrf.mxu0 }
 0x36a   : > { %v3790_v38 = vmul.f32 0.17677669, %v1661_v11 }
 0x36b   : > { %v1335_v51 = vsel %vm1192_vm3, %v1333_v50, -inf }
 0x36c   : > { %1336 = vmax.xlane.f32.xlu1 %v1335_v51  ;;  %v1668_v14 = vsel %vm1192_vm3, %v3790_v38, -inf  ;;  %v1532_v51 = vsub.f32 %v3724_v4, %v1528_v24 }
 0x36e   : > { %v1534_v16 = vmul.f32 1.442695, %v1532_v51  ;;  %v1205_v51 = vsel %vm1192_vm3, %v3749_v37, 0.0 }
 0x370   : > { %v1256_v52 = vpop.f32.mrf.mxu3  ;;  %v1330_v53 = vpop.f32.mrf.mxu1 }
 0x371   : > { %v3766_v54 = vmul.f32 0.17677669, %v1256_v52  ;;  %v1334_v55 = vmul.f32 0.17677669, %v1330_v53  ;;  %v1663_v15 = vpop.f32.mrf.mxu0  ;;  %v1688_v52 = vpop.permute.xlu0 %1687  ;;  %v1536_v53 = vmul.f32 1.442695, %v1533_v13 }
 0x372   : > { %v3794_v17 = vmul.f32 0.17677669, %v1663_v15 }
 0x373   : > { %v1263_v56 = vsel %vm1192_vm3, %v3766_v54, -inf  ;;  %v1338_v57 = vsel %vm1192_vm3, %v1334_v55, -inf }
 0x374   : > { %1264 = vmax.xlane.f32.xlu1 %v1263_v56  ;;  %1339 = vmax.xlane.f32.xlu2 %v1338_v57  ;;  %v1671_v18 = vsel %vm1192_vm3, %v3794_v17, -inf }
 0x378   : > { %v1258_v63 = vpop.f32.mrf.mxu3 }
 0x379   : > { %v3782_v6 = vmul.f32 0.17677669, %v1258_v63 }
 0x37b   : > { %v1266_v7 = vsel %vm1192_vm3, %v3782_v6, -inf }
 0x37c   : > { %1410 = vmax.xlane.f32.xlu2 %v1409_v60 }
 0x384   : > { %1597 = vmax.xlane.f32.xlu2 %v1596_v61 }
 0x38c   : > { %1600 = vmax.xlane.f32.xlu2 %v1599_v3 }
 0x38d   : > { %1616 = vrot.lane.b32.xlu1 %v3744_v30, %s3378_s22 }
 0x394   : > { %1267 = vmax.xlane.f32.xlu2 %v1266_v7 }
 0x39c   : > { %1740 = vmax.xlane.f32.xlu2 %v1739_v12 }
 0x3a4   : > { %1669 = vmax.xlane.f32.xlu2 %v1668_v14 }
 0x3ac   : > { %1672 = vmax.xlane.f32.xlu2 %v1671_v18 }
 0x3b7   : > { %1743 = vmax.xlane.f32.xlu1 %v1742_v23 }
 0x3c4   : > { %1758 = vrot.lane.b32.xlu2 %v3744_v30, %s3377_s9 }
 0x3df   : > { %v1337_v27 = vpop.xlane.xlu1 %1336 }
 0x3e0   : > { %v1341_v28 = vsub.f32 %v1333_v50, %v1337_v27 }
 0x3e2   : > { %v1343_v31 = vmul.f32 1.442695, %v1341_v28 }
 0x3e4   : > { %3114 = vpow2.f32 %v1343_v31 }
 0x3e5   : > { %3116 = vpow2.f32 %v1414_v32 }
 0x3e7   : > { %v1340_v33 = vpop.xlane.xlu2 %1339  ;;  %v1265_v60 = vpop.xlane.xlu1 %1264 }
 0x3e8   : > { %v1342_v34 = vsub.f32 %v1334_v55, %v1340_v33  ;;  %v1269_v3 = vsub.f32 %v3766_v54, %v1265_v60 }
 0x3ea   : > { %v3115_v35 = vpop.eup %3114  ;;  %v1345_v36 = vmul.f32 1.442695, %v1342_v34  ;;  %v1271_v11 = vmul.f32 1.442695, %v1269_v3 }
 0x3eb   : > { %v1347_v40 = vsel %vm1192_vm3, %v3115_v35, 0.0  ;;  %v3806_v42 = vpop.eup %3116 }
 0x3ec   : > { %1348 = vadd.xlane.f32.xlu1 %v1347_v40  ;;  %3118 = vpow2.f32 %v1345_v36  ;;  %v1418_v46 = vsel %vm1192_vm3, %v3806_v42, 0.0 }
 0x3ef   : > { %v1411_v30 = vpop.xlane.xlu2 %1410 }
 0x3f0   : > { %v1413_v43 = vsub.f32 %v1405_v59, %v1411_v30 }
 0x3f2   : > { %v1416_v44 = vmul.f32 1.442695, %v1413_v43  ;;  %v3119_v45 = vpop.eup %3118 }
 0x3f3   : > { %v1353_v49 = vpack.c.bf16 %v3119_v45, %v3115_v35  ;;  %v1350_v50 = vsel %vm1192_vm3, %v3119_v45, 0.0 }
 0x3f4   : > { %3120 = vpow2.f32 %v1416_v44  ;;  %1419 = vadd.xlane.f32.xlu1 %v1418_v46  ;;  %1351 = vadd.xlane.f32.xlu0 %v1350_v50  ;;  %v1208_v44 = vsel %vm1192_vm3, %v3751_v39, 0.0 }
 0x3f5   : > { %2762 = vmatmul.msk.bf16.vlgmr.msra.gmra.mxu1 %vm1192_vm3, %v1353_v49  ;;  %3122 = vpow2.f32 %v1536_v53 }
 0x3f6   : > { %1700 = vmatpush.bf16.msra.mxu1 %v1688_v52 }
 0x3f7   : > { %v1598_v55 = vpop.xlane.xlu2 %1597 }
 0x3f8   : > { %v1602_v56 = vsub.f32 %v3772_v1, %v1598_v55 }
 0x3fa   : > { %v3121_v57 = vpop.eup %3120  ;;  %v1604_v58 = vmul.f32 1.442695, %v1602_v56 }
 0x3fb   : > { %v1421_v59 = vsel %vm1192_vm3, %v3121_v57, 0.0  ;;  %v3123_v61 = vpop.eup %3122  ;;  %v1424_v30 = vpack.c.bf16 %v3121_v57, %v3806_v42 }
 0x3fc   : > { %3124 = vpow2.f32 %v1604_v58  ;;  %1422 = vadd.xlane.f32.xlu1 %v1421_v59  ;;  %v1541_v42 = vsel %vm1192_vm3, %v3123_v61, 0.0 }
 0x3fd   : > { %3126 = vpow2.f32 %v1534_v16 }
 0x3ff   : > { %v1601_v4 = vpop.xlane.xlu2 %1600 }
 0x400   : > { %v1603_v0 = vsub.f32 %v3776_v62, %v1601_v4 }
 0x402   : > { %v3817_v2 = vpop.eup %3124  ;;  %v1606_v63 = vmul.f32 1.442695, %v1603_v0 }
 0x403   : > { %v3820_v1 = vpop.eup %3126  ;;  %v1608_v7 = vsel %vm1192_vm3, %v3817_v2, 0.0 }
 0x404   : > { %v1544_v10 = vpack.c.bf16 %v3123_v61, %v3820_v1  ;;  %3128 = vpow2.f32 %v1606_v63  ;;  %1609 = vadd.xlane.f32.xlu1 %v1608_v7  ;;  %v1538_v53 = vsel %vm1192_vm3, %v3820_v1, 0.0 }
 0x405   : > { %3130 = vpow2.f32 %v1271_v11 }
 0x406   : > { %2766 = vmatmul.msk.bf16.vlgmr.msrb.gmra.mxu1 %vm1192_vm3, %v1544_v10 }
 0x407   : > { %v1268_v12 = vpop.xlane.xlu2 %1267 }
 0x408   : > { %v1270_v62 = vsub.f32 %v3782_v6, %v1268_v12  ;;  %v1617_v6 = vpop.permute.xlu1 %1616 }
 0x40a   : > { %v3129_v14 = vpop.eup %3128  ;;  %v1273_v15 = vmul.f32 1.442695, %v1270_v62 }
 0x40b   : > { %v1611_v54 = vsel %vm1192_vm3, %v3129_v14, 0.0  ;;  %v3131_v19 = vpop.eup %3130  ;;  %v1614_v39 = vpack.c.bf16 %v3129_v14, %v3817_v2 }
 0x40c   : > { %3132 = vpow2.f32 %v1273_v15  ;;  %1612 = vadd.xlane.f32.xlu1 %v1611_v54  ;;  %v1275_v28 = vsel %vm1192_vm3, %v3131_v19, 0.0 }
 0x40f   : > { %v1741_v18 = vpop.xlane.xlu2 %1740 }
 0x410   : > { %v1745_v23 = vsub.f32 %v3786_v5, %v1741_v18 }
 0x412   : > { %v3133_v24 = vpop.eup %3132  ;;  %v1747_v26 = vmul.f32 1.442695, %v1745_v23 }
 0x413   : > { %v1281_v27 = vpack.c.bf16 %v3133_v24, %v3131_v19  ;;  %v1278_v29 = vsel %vm1192_vm3, %v3133_v24, 0.0 }
 0x414   : > { %3134 = vpow2.f32 %v1747_v26  ;;  %1276 = vadd.xlane.f32.xlu1 %v1275_v28  ;;  %1279 = vadd.xlane.f32.xlu2 %v1278_v29 }
 0x415   : > { %2760 = vmatmul.msk.bf16.vlgmr.msrb.gmra.mxu3 %vm1192_vm3, %v1281_v27 }
 0x416   : > { %1629 = vmatpush.bf16.msrb.mxu3 %v1617_v6 }
 0x417   : > { %v1670_v31 = vpop.xlane.xlu2 %1669 }
 0x418   : > { %v1674_v32 = vsub.f32 %v3790_v38, %v1670_v31 }
 0x41a   : > { %v3135_v33 = vpop.eup %3134  ;;  %v1676_v34 = vmul.f32 1.442695, %v1674_v32 }
 0x41b   : > { %v1751_v5 = vsel %vm1192_vm3, %v3135_v33, 0.0 }
 0x41c   : > { %3136 = vpow2.f32 %v1676_v34  ;;  %1752 = vadd.xlane.f32.xlu0 %v1751_v5 }
 0x41f   : > { %v1673_v35 = vpop.xlane.xlu2 %1672 }
 0x420   : > { %v1675_v36 = vsub.f32 %v3794_v17, %v1673_v35 }
 0x422   : > { %v3137_v40 = vpop.eup %3136  ;;  %v1678_v41 = vmul.f32 1.442695, %v1675_v36 }
 0x423   : > { %v1680_v43 = vsel %vm1192_vm3, %v3137_v40, 0.0 }
 0x424   : > { %3138 = vpow2.f32 %v1678_v41  ;;  %1681 = vadd.xlane.f32.xlu2 %v1680_v43  ;;  %1209 = vadd.xlane.f32.xlu0 %v1208_v44 }
 0x425   : > { %2764 = vmatmul.msk.bf16.vlgmr.msra.gmra.mxu3 %vm1192_vm3, %v1424_v30 }
 0x427   : > { %v1759_v38 = vpop.permute.xlu2 %1758 }
 0x428   : > { %1771 = vmatpush.bf16.msra.mxu3 %v1759_v38 }
 0x42a   : > { %v3139_v45 = vpop.eup %3138  ;;  %v1744_v13 = vpop.xlane.xlu1 %1743 }
 0x42b   : > { %v1686_v46 = vpack.c.bf16 %v3139_v45, %v3137_v40  ;;  %v1746_v17 = vsub.f32 %v3798_v20, %v1744_v13  ;;  %v1683_v49 = vsel %vm1192_vm3, %v3139_v45, 0.0 }
 0x42c   : > { %1684 = vadd.xlane.f32.xlu1 %v1683_v49  ;;  %1542 = vadd.xlane.f32.xlu0 %v1541_v42 }
 0x42d   : > { %v1749_v50 = vmul.f32 1.442695, %v1746_v17  ;;  %2770 = vmatmul.msk.bf16.vlgmr.msra.gmra.mxu1 %vm1192_vm3, %v1686_v46 }
 0x42f   : > { %3140 = vpow2.f32 %v1749_v50 }
 0x434   : > { %1206 = vadd.xlane.f32.xlu1 %v1205_v51 }
 0x435   : > { %v3141_v52 = vpop.eup %3140  ;;  %2768 = vmatmul.msk.bf16.vlgmr.msrb.gmra.mxu3 %vm1192_vm3, %v1614_v39 }
 0x436   : > { %v1754_v20 = vsel %vm1192_vm3, %v3141_v52, 0.0  ;;  %v1757_v55 = vpack.c.bf16 %v3141_v52, %v3135_v33 }
 0x437   : > { %1755 = vadd.xlane.f32.xlu2 %v1754_v20 }
 0x43c   : > { %1539 = vadd.xlane.f32.xlu1 %v1538_v53 }
 0x445   : > { %2772 = vmatmul.msk.bf16.vlgmr.msra.gmra.mxu3 %vm1192_vm3, %v1757_v55 }
 0x45f   : > { %v1349_v56 = vpop.xlane.xlu1 %1348 }
 0x460   : > { %3142 = vrcp.f32 %v1349_v56 }
 0x466   : > { %v3143_v59 = vpop.eup %3142 }
 0x467   : > { %v1420_v16 = vpop.xlane.xlu1 %1419  ;;  %v1352_v57 = vpop.xlane.xlu0 %1351 }
 0x468   : > { %3144 = vrcp.f32 %v1352_v57 }
 0x46e   : > { %v3145_v4 = vpop.eup %3144 }
 0x46f   : > { %v1423_v37 = vpop.xlane.xlu1 %1422 }
 0x472   : > { %v1369_v58 = vpop.f32.mrf.mxu1 }
 0x473   : > { %v1376_v60 = vmul.f32 %v3143_v59, %v1369_v58 }
 0x475   : > { %v1378_v61 = vpack.c.bf16 %v1376_v60, %v1376_v60 }
 0x477   : > { %v1610_v63 = vpop.xlane.xlu1 %1609  ;;  %v1465_v1 = vunpack.c.l.b16 %v1378_v61 }
 0x47a   : > { %v1371_v0 = vpop.f32.mrf.mxu1 }
 0x47b   : > { %v1377_v2 = vmul.f32 %v3145_v4, %v1371_v0 }
 0x47d   : > { %v1379_v3 = vpack.c.bf16 %v1377_v2, %v1377_v2 }
 0x47f   : > { %v1466_v7 = vunpack.c.l.b16 %v1379_v3  ;;  %v1613_v11 = vpop.xlane.xlu1 %1612 }
 0x481   : > { %v1467_v10 = vpack.c.b16 %v1466_v7, %v1465_v1 }
 0x483   : > { %1468 = vrot.lane.b32.xlu1 %v1467_v10, %s3379_s23  ;;  %v1557_v6 = vpop.f32.mrf.mxu1 }
 0x487   : > { %v1277_v12 = vpop.xlane.xlu1 %1276  ;;  %v1280_v14 = vpop.xlane.xlu2 %1279 }
 0x488   : > { %3146 = vrcp.f32 %v1277_v12 }
 0x489   : > { %3148 = vrcp.f32 %v1280_v14 }
 0x48a   : > { %3150 = vrcp.f32 %v1420_v16 }
 0x48b   : > { %3152 = vrcp.f32 %v1423_v37  ;;  %v1559_v41 = vpop.f32.mrf.mxu1 }
 0x48e   : > { %v3147_v54 = vpop.eup %3146 }
 0x48f   : > { %v3853_v62 = vpop.xlane.xlu0 %1752  ;;  %v3149_v24 = vpop.eup %3148 }
 0x490   : > { %v3151_v36 = vpop.eup %3150 }
 0x491   : > { %v3153_v30 = vpop.eup %3152 }
 0x497   : > { %v3855_v18 = vpop.xlane.xlu0 %1209  ;;  %v1682_v56 = vpop.xlane.xlu2 %1681 }
 0x498   : > { %v1298_v15 = vpop.f32.mrf.mxu3 }
 0x499   : > { %v1305_v19 = vmul.f32 %v3147_v54, %v1298_v15 }
 0x49b   : > { %v1307_v27 = vpack.c.bf16 %v1305_v19, %v1305_v19 }
 0x49d   : > { %v1458_v31 = vunpack.c.l.b16 %v1307_v27 }
 0x49f   : > { %v1685_v23 = vpop.xlane.xlu1 %1684  ;;  %v1543_v33 = vpop.xlane.xlu0 %1542 }
 0x4a0   : > { %v1300_v26 = vpop.f32.mrf.mxu3  ;;  %3154 = vrcp.f32 %v1543_v33 }
 0x4a1   : > { %v1306_v28 = vmul.f32 %v3149_v24, %v1300_v26 }
 0x4a3   : > { %v1308_v29 = vpack.c.bf16 %v1306_v28, %v1306_v28 }
 0x4a5   : > { %v1459_v32 = vunpack.c.l.b16 %v1308_v29 }
 0x4a6   : > { %v3155_v44 = vpop.eup %3154 }
 0x4a7   : > { %v1460_v34 = vpack.c.b16 %v1459_v32, %v1458_v31  ;;  %v3857_v5 = vpop.xlane.xlu1 %1206  ;;  %v1565_v46 = vmul.f32 %v3155_v44, %v1559_v41  ;;  %v2986_v41 = vld [vmem:[%s3541_s24 + $0x30] sm:$0xff]  ;;  %v2983_v44 = vld [vmem:[%s3541_s24 + $0x18] sm:$0xff] }
 0x4a8   : > { %v1440_v35 = vpop.f32.mrf.mxu3 }
 0x4a9   : > { %1461 = vrot.lane.b32.xlu2 %v1460_v34, %s3377_s9  ;;  %v1447_v40 = vmul.f32 %v3151_v36, %v1440_v35  ;;  %v1567_v51 = vpack.c.bf16 %v1565_v46, %v1565_v46 }
 0x4aa   : > { %v1702_v39 = vpop.f32.mrf.mxu1  ;;  %v1756_v14 = vpop.xlane.xlu2 %1755 }
 0x4ab   : > { %v1449_v45 = vpack.c.bf16 %v1447_v40, %v1447_v40  ;;  %v3863_v57 = vunpack.c.l.b16 %v1567_v51  ;;  %v2987_v40 = vld [vmem:[%s3541_s24 + $0x38] sm:$0xff] }
 0x4ac   : > { %1907 = vmatpush.bf16.msrb.mxu0 %v2987_v40 }
 0x4ad   : > { %v1472_v49 = vunpack.c.l.b16 %v1449_v45  ;;  %v2981_v45 = vld [vmem:[%s3541_s24 + $0x8] sm:$0xff] }
 0x4af   : > { %v1540_v43 = vpop.xlane.xlu1 %1539 }
 0x4b0   : > { %3156 = vrcp.f32 %v1540_v43  ;;  %v1442_v38 = vpop.f32.mrf.mxu3  ;;  %1908 = vmatpush.bf16.msrb.mxu0 %v2986_v41  ;;  %v2984_v43 = vld [vmem:[%s3541_s24 + $0x20] sm:$0xff] }
 0x4b1   : > { %v1448_v13 = vmul.f32 %v3153_v30, %v1442_v38  ;;  %3158 = vrcp.f32 %v1610_v63  ;;  %v2985_v30 = vld [vmem:[%s3541_s24 + $0x28] sm:$0xff]  ;;  %v2982_v38 = vld [vmem:[%s3541_s24 + $0x10] sm:$0xff] }
 0x4b2   : > { %3160 = vrcp.f32 %v1613_v11  ;;  %v1704_v4 = vpop.f32.mrf.mxu1 }
 0x4b3   : > { %v1450_v17 = vpack.c.bf16 %v1448_v13, %v1448_v13  ;;  %3162 = vrcp.f32 %v1685_v23  ;;  %v2980_v13 = vld [vmem:[%s3541_s24] sm:$0xff] }
 0x4b4   : > { %3164 = vrcp.f32 %v1682_v56  ;;  %1909 = vmatpush.bf16.msrb.mxu0 %v2985_v30 }
 0x4b5   : > { %v1473_v42 = vunpack.c.l.b16 %v1450_v17  ;;  %3166 = vrcp.f32 %v3853_v62 }
 0x4b6   : > { %v3157_v50 = vpop.eup %3156  ;;  %3168 = vrcp.f32 %v1756_v14 }
 0x4b7   : > { %v1564_v52 = vmul.f32 %v3157_v50, %v1557_v6  ;;  %v1474_v20 = vpack.c.b16 %v1473_v42, %v1472_v49  ;;  %v3159_v58 = vpop.eup %3158  ;;  %3170 = vrcp.f32 %v3857_v5 }
 0x4b8   : > { %v1631_v53 = vpop.f32.mrf.mxu3  ;;  %v3161_v60 = vpop.eup %3160  ;;  %1910 = vmatpush.bf16.msrb.mxu0 %v2984_v43  ;;  %3172 = vrcp.f32 %v3855_v18 }
 0x4b9   : > { %v1566_v55 = vpack.c.bf16 %v1564_v52, %v1564_v52  ;;  %1475 = vrot.lane.b32.xlu0 %v1474_v20, %s3378_s22  ;;  %v1638_v37 = vmul.f32 %v3159_v58, %v1631_v53  ;;  %v3163_v3 = vpop.eup %3162 }
 0x4ba   : > { %v1710_v63 = vmul.f32 %v3163_v3, %v1704_v4  ;;  %v3165_v7 = vpop.eup %3164 }
 0x4bb   : > { %v3861_v16 = vunpack.c.l.b16 %v1566_v55  ;;  %v1640_v61 = vpack.c.bf16 %v1638_v37, %v1638_v37  ;;  %v1709_v10 = vmul.f32 %v3165_v7, %v1702_v39  ;;  %v3167_v26 = vpop.eup %3166 }
 0x4bc   : > { %v1712_v15 = vpack.c.bf16 %v1710_v63, %v1710_v63  ;;  %v3169_v6 = vpop.eup %3168  ;;  %1911 = vmatpush.bf16.msrb.mxu0 %v2983_v44 }
 0x4bd   : > { %v1788_v59 = vpack.c.b16 %v3863_v57, %v3861_v16  ;;  %v1791_v11 = vunpack.c.l.b16 %v1640_v61  ;;  %v1711_v23 = vpack.c.bf16 %v1709_v10, %v1709_v10  ;;  %v3171_v46 = vpop.eup %3170 }
 0x4be   : > { %v1799_v24 = vunpack.c.l.b16 %v1712_v15  ;;  %v3173_v17 = vpop.eup %3172  ;;  %v1231_v49 = vmul.f32 %v3171_v46, %v3761_v47  ;;  %v1846_v15 = vperm.slane %v3699_v25, 3  ;;  %v3380_v25 = vmov 128.0  }
 0x4bf   : > { %v1798_v27 = vunpack.c.l.b16 %v1711_v23  ;;  %v1232_v42 = vmul.f32 %v3173_v17, %v3763_v48  ;;  %3174 = vrcp.f32 %v3380_v25 }
 0x4c0   : > { %v1633_v0 = vpop.f32.mrf.mxu3  ;;  %1912 = vmatpush.bf16.msrb.mxu0 %v2982_v38  ;;  %v1233_v50 = vpack.c.bf16 %v1231_v49, %v1231_v49 }
 0x4c1   : > { %v1639_v2 = vmul.f32 %v3161_v60, %v1633_v0  ;;  %v1800_v29 = vpack.c.b16 %v1799_v24, %v1798_v27  ;;  %v1234_v39 = vpack.c.bf16 %v1232_v42, %v1232_v42  ;;  %v2871_v42 = vld [vmem:[%s3530_s6 + $0x70] sm:$0xf] }
 0x4c2   : > { %v1453_v51 = vunpack.c.l.b16 %v1233_v50  ;;  %v3003_v50 = vld [vmem:[%s3530_s6 + $0x74] sm:$0xf0] }
 0x4c3   : > { %v1641_v1 = vpack.c.bf16 %v1639_v2, %v1639_v2  ;;  %v1454_v52 = vunpack.c.l.b16 %v1234_v39  ;;  %v3002_v39 = vld [vmem:[%s3530_s6 + $0x74] sm:$0xf] }
 0x4c4   : > { %1913 = vmatpush.bf16.msrb.mxu0 %v2981_v45 }
 0x4c5   : > { %v1792_v12 = vunpack.c.l.b16 %v1641_v1  ;;  %v1455_v53 = vpack.c.b16 %v1454_v52, %v1453_v51  ;;  %v2872_v51 = vor.u32 %v3003_v50, %v2871_v42  ;;  %v2873_v52 = vld [vmem:[%s3530_s6 + $0x78] sm:$0xf0] }
 0x4c7   : > { %v1793_v54 = vpack.c.b16 %v1792_v12, %v1791_v11  ;;  %2131 = vmatpush.bf16.msrb.mxu1 %v2872_v51 }
 0x4c8   : > { %v1773_v19 = vpop.f32.mrf.mxu3  ;;  %1914 = vmatpush.bf16.msrb.mxu0 %v2980_v13 }
 0x4c9   : > { %1794 = vrot.lane.b32.xlu2 %v1793_v54, %s3377_s9  ;;  %v1780_v28 = vmul.f32 %v3167_v26, %v1773_v19 }
 0x4cb   : > { %v1782_v62 = vpack.c.bf16 %v1780_v28, %v1780_v28 }
 0x4cd   : > { %v1805_v34 = vunpack.c.l.b16 %v1782_v62 }
 0x4d0   : > { %v1775_v31 = vpop.f32.mrf.mxu3 }
 0x4d1   : > { %v1781_v32 = vmul.f32 %v3169_v6, %v1775_v31  ;;  %1801 = vrot.lane.b32.xlu2 %v1800_v29, %s3379_s23  ;;  %v3175_v31 = vpop.eup %3174 }
 0x4d2   : > { %vm1943_vm6 = vweird.f32 %v3175_v31 }
 0x4d3   : > { %v1783_v33 = vpack.c.bf16 %v1781_v32, %v1781_v32 }
 0x4d5   : > { %v1806_v35 = vunpack.c.l.b16 %v1783_v33 }
 0x4d7   : > { %v1807_v36 = vpack.c.b16 %v1806_v35, %v1805_v34 }
 0x4d9   : > { %1808 = vrot.lane.b32.xlu0 %v1807_v36, %s3378_s22 }
 0x4f5   : > { %v1469_v18 = vpop.permute.xlu1 %1468 }
 0x503   : > { %v1462_v20 = vpop.permute.xlu2 %1461 }
 0x504   : > { %v1479_v5 = vsel %vm1169_vm2, %v1455_v53, %v1462_v20  ;;  %v2876_v20 = vor.u32 %v3002_v39, %v2873_v52  ;;  %v2863_v53 = vld [vmem:[%s3530_s6 + $0x60] sm:$0xf] }
 0x505   : > { %v1482_v55 = vsel %vm1480_vm4, %v1479_v5, %v1469_v18  ;;  %v3001_v5 = vld [vmem:[%s3530_s6 + $0x64] sm:$0xf0]  ;;  %v3000_v18 = vld [vmem:[%s3530_s6 + $0x64] sm:$0xf] }
 0x506   : > { %2150 = vmatpush.bf16.msra.mxu2 %v2876_v20 }
 0x523   : > { %v1795_v0 = vpop.permute.xlu2 %1794 }
 0x524   : > { %v1812_v2 = vsel %vm1169_vm2, %v1788_v59, %v1795_v0 }
 0x52b   : > { %v1476_v56 = vpop.permute.xlu0 %1475  ;;  %v1802_v61 = vpop.permute.xlu2 %1801 }
 0x52c   : > { %v1485_v58 = vsel %vm1483_vm5, %v1482_v55, %v1476_v56  ;;  %v1814_v3 = vsel %vm1480_vm4, %v1812_v2, %v1802_v61  ;;  %v2864_v55 = vor.u32 %v3001_v5, %v2863_v53  ;;  %v2865_v56 = vld [vmem:[%s3530_s6 + $0x68] sm:$0xf0]  ;;  %v2847_v61 = vld [vmem:[%s3530_s6 + $0x40] sm:$0xf]  ;;  %v2997_v2 = vld [vmem:[%s3530_s6 + $0x44] sm:$0xf0] }
 0x52d   : > { %v1487_v37 = vunpack.c.l.b16 %v1485_v58  ;;  %v1488_v47 = vunpack.c.h.b16 %v1485_v58  ;;  %v2868_v58 = vor.u32 %v3000_v18, %v2865_v56  ;;  %v3955_v18 = vld [vmem:[%s3551_s20] sm:$0xff] }
 0x52e   : > { %2132 = vmatpush.bf16.msrb.mxu1 %v2864_v55  ;;  %v2017_v55 = vperm.slane %v3955_v18, 4 }
 0x52f   : > { %v1489_v60 = vpack.c.b16 %v1487_v37, %v1487_v37  ;;  %v1490_v48 = vpack.c.b16 %v1488_v47, %v1488_v47  ;;  %2151 = vmatpush.bf16.msra.mxu2 %v2868_v58  ;;  %v2855_v37 = vld [vmem:[%s3530_s6 + $0x50] sm:$0xf]  ;;  %v2999_v47 = vld [vmem:[%s3530_s6 + $0x54] sm:$0xf0] }
 0x531   : > { %1493 = vst [vmem:[#allocation4] sm:$0xf] %v1489_v60  ;;  %v2998_v60 = vld [vmem:[%s3530_s6 + $0x54] sm:$0xf] }
 0x532   : > { %1494 = vst [vmem:[#allocation4 + $0x4] sm:$0xf] %v1490_v48  ;;  %v2856_v48 = vor.u32 %v2999_v47, %v2855_v37 }
 0x534   : > { %2133 = vmatpush.bf16.msrb.mxu1 %v2856_v48 }
 0x539   : > { %v2978_v4 = vld [vmem:[#allocation4] sm:$0xff] }
 0x53a   : > { %1915 = vmatmul.bf16.vlgmr.msrb.gmra.mxu0 %v2978_v4  ;;  %v2857_v4 = vld [vmem:[%s3530_s6 + $0x58] sm:$0xf0] }
 0x53b   : > { %v2860_v0 = vor.u32 %v2998_v60, %v2857_v4  ;;  %v2022_v60 = vperm.slane %v3955_v18, 5 }
 0x53d   : > { %2152 = vmatpush.bf16.msra.mxu2 %v2860_v0 }
 0x54b   : > { %v1809_v63 = vpop.permute.xlu0 %1808 }
 0x54c   : > { %v1816_v1 = vsel %vm1483_vm5, %v1814_v3, %v1809_v63  ;;  %v2996_v3 = vld [vmem:[%s3530_s6 + $0x44] sm:$0xf]  ;;  %v2848_v63 = vor.u32 %v2997_v2, %v2847_v61 }
 0x54d   : > { %v1818_v7 = vunpack.c.l.b16 %v1816_v1  ;;  %v1819_v10 = vunpack.c.h.b16 %v1816_v1  ;;  %v2849_v1 = vld [vmem:[%s3530_s6 + $0x48] sm:$0xf0] }
 0x54e   : > { %2134 = vmatpush.bf16.msrb.mxu1 %v2848_v63  ;;  %v3019_v63 = vld [vmem:[%s3553_s16 + $0x78] sm:$0xff] }
 0x54f   : > { %v1820_v11 = vpack.c.b16 %v1818_v7, %v1818_v7  ;;  %v1821_v12 = vpack.c.b16 %v1819_v10, %v1819_v10  ;;  %v2852_v7 = vor.u32 %v2996_v3, %v2849_v1  ;;  %v2839_v10 = vld [vmem:[%s3530_s6 + $0x30] sm:$0xf]  ;;  %2329 = vmatpush.bf16.msra.mxu0 %v3019_v63 }
 0x551   : > { %1824 = vst [vmem:[#allocation4 + $0x8] sm:$0xf] %v1820_v11  ;;  %2153 = vmatpush.bf16.msra.mxu2 %v2852_v7  ;;  %v2995_v11 = vld [vmem:[%s3530_s6 + $0x34] sm:$0xf0] }
 0x552   : > { %1825 = vst [vmem:[#allocation4 + $0xc] sm:$0xf] %v1821_v12  ;;  %v2994_v12 = vld [vmem:[%s3530_s6 + $0x34] sm:$0xf] }
 0x559   : > { %v2979_v14 = vld [vmem:[#allocation4 + $0x8] sm:$0xff] }
 0x55a   : > { %1920 = vmatmul.bf16.gmra.mxu0 %v2979_v14  ;;  %v2840_v14 = vor.u32 %v2995_v11, %v2839_v10  ;;  %v3010_v10 = vld [vmem:[%s3553_s16 + $0x30] sm:$0xff] }
 0x55b   : > { %v3018_v11 = vld [vmem:[%s3553_s16 + $0x70] sm:$0xff] }
 0x55c   : > { %2135 = vmatpush.bf16.msrb.mxu1 %v2840_v14  ;;  %2330 = vmatpush.bf16.msra.mxu0 %v3018_v11 }
 0x5b7   : > { %v1916_v54 = vpop.f32.mrf.mxu0 }
 0x5b8   : > { %v1917_v19 = vadd.f32 %v1916_v54, %v1846_v15 }
 0x5ba   : > { %v1926_v16 = vadd.f32 %v1917_v19, %v3680_v8  ;;  %v1939_v8 = vmul.f32 128.0, %v3175_v31  ;;  %v2831_v19 = vld [vmem:[%s3530_s6 + $0x20] sm:$0xf] }
 0x5bc   : > { %1930 = vadd.xlane.f32.xlu1 %v1926_v16  ;;  %v1940_v62 = vsub.f32 1.0, %v1939_v8 }
 0x5be   : > { %v1941_v32 = vmul.f32 %v3175_v31, %v1940_v62  ;;  %v2815_v62 = vld [vmem:[%s3530_s6] sm:$0xf] }
 0x5bf   : > { %v1918_v57 = vpop.f32.mrf.mxu0 }
 0x5c0   : > { %v1919_v59 = vadd.f32 %v1918_v57, %v1846_v15  ;;  %v1942_v33 = vadd.f32 %v3175_v31, %v1941_v32  ;;  %v2992_v57 = vld [vmem:[%s3530_s6 + $0x24] sm:$0xf]  ;;  %v2989_v32 = vld [vmem:[%s3530_s6 + $0x4] sm:$0xf0] }
 0x5c2   : > { %v1927_v23 = vadd.f32 %v1919_v59, %v3682_v9  ;;  %v3897_v9 = vsel %vm1943_vm6, %v3175_v31, %v1942_v33  ;;  %v2988_v33 = vld [vmem:[%s3530_s6 + $0x4] sm:$0xf] }
 0x5c4   : > { %1932 = vadd.xlane.f32.xlu2 %v1927_v23 }
 0x5d7   : > { %v1921_v24 = vpop.f32.mrf.mxu0 }
 0x5d8   : > { %v1922_v26 = vadd.f32 %v1921_v24, %v1846_v15 }
 0x5da   : > { %v1928_v27 = vadd.f32 %v1922_v26, %v3692_v21  ;;  %v2823_v26 = vld [vmem:[%s3530_s6 + $0x10] sm:$0xf] }
 0x5dc   : > { %1934 = vadd.xlane.f32.xlu0 %v1928_v27 }
 0x5df   : > { %v1923_v28 = vpop.f32.mrf.mxu0 }
 0x5e0   : > { %v1924_v29 = vadd.f32 %v1923_v28, %v1846_v15  ;;  %v2841_v15 = vld [vmem:[%s3530_s6 + $0x38] sm:$0xf0]  ;;  %v2990_v28 = vld [vmem:[%s3530_s6 + $0x14] sm:$0xf] }
 0x5e1   : > { %v2844_v54 = vor.u32 %v2994_v12, %v2841_v15 }
 0x5e2   : > { %v1929_v6 = vadd.f32 %v1924_v29, %v3694_v22 }
 0x5e3   : > { %2154 = vmatpush.bf16.msra.mxu2 %v2844_v54  ;;  %v3009_v54 = vld [vmem:[%s3553_s16 + $0x28] sm:$0xff] }
 0x5e4   : > { %1936 = vadd.xlane.f32.xlu1 %v1929_v6 }
 0x62f   : > { %v1931_v34 = vpop.xlane.xlu1 %1930 }
 0x630   : > { %v1945_v35 = vmul.f32 %v3897_v9, %v1931_v34 }
 0x632   : > { %v3900_v21 = vsub.f32 %v1926_v16, %v1945_v35  ;;  %v2993_v16 = vld [vmem:[%s3530_s6 + $0x24] sm:$0xf0]  ;;  %v2816_v35 = vor.u32 %v2989_v32, %v2815_v62 }
 0x633   : > { %v2832_v59 = vor.u32 %v2993_v16, %v2831_v19  ;;  %v3017_v19 = vld [vmem:[%s3553_s16 + $0x68] sm:$0xff] }
 0x634   : > { %v1953_v36 = vmul.f32 %v3900_v21, %v3900_v21  ;;  %2331 = vmatpush.bf16.msra.mxu0 %v3017_v19 }
 0x635   : > { %2136 = vmatpush.bf16.msrb.mxu1 %v2832_v59  ;;  %v3008_v59 = vld [vmem:[%s3553_s16 + $0x20] sm:$0xff] }
 0x636   : > { %1957 = vadd.xlane.f32.xlu2 %v1953_v36  ;;  %v2817_v36 = vld [vmem:[%s3530_s6 + $0x8] sm:$0xf0] }
 0x637   : > { %v1933_v22 = vpop.xlane.xlu2 %1932 }
 0x638   : > { %v1946_v40 = vmul.f32 %v3897_v9, %v1933_v22  ;;  %v2820_v22 = vor.u32 %v2988_v33, %v2817_v36 }
 0x63a   : > { %v3905_v41 = vsub.f32 %v1927_v23, %v1946_v40  ;;  %v2833_v23 = vld [vmem:[%s3530_s6 + $0x28] sm:$0xf0] }
 0x63b   : > { %v2836_v24 = vor.u32 %v2992_v57, %v2833_v23 }
 0x63c   : > { %v1954_v30 = vmul.f32 %v3905_v41, %v3905_v41 }
 0x63d   : > { %2155 = vmatpush.bf16.msra.mxu2 %v2836_v24 }
 0x63e   : > { %1959 = vadd.xlane.f32.xlu0 %v1954_v30 }
 0x64f   : > { %v1935_v43 = vpop.xlane.xlu0 %1934 }
 0x650   : > { %v1947_v44 = vmul.f32 %v3897_v9, %v1935_v43 }
 0x652   : > { %v3910_v38 = vsub.f32 %v1928_v27, %v1947_v44  ;;  %v2991_v27 = vld [vmem:[%s3530_s6 + $0x14] sm:$0xf0] }
 0x653   : > { %v2824_v29 = vor.u32 %v2991_v27, %v2823_v26 }
 0x654   : > { %v1955_v45 = vmul.f32 %v3910_v38, %v3910_v38 }
 0x655   : > { %2137 = vmatpush.bf16.msrb.mxu1 %v2824_v29 }
 0x656   : > { %1961 = vadd.xlane.f32.xlu1 %v1955_v45 }
 0x657   : > { %v1937_v13 = vpop.xlane.xlu1 %1936 }
 0x658   : > { %v1948_v46 = vmul.f32 %v3897_v9, %v1937_v13 }
 0x659   : > { %2138 = vmatpush.bf16.msrb.mxu1 %v2816_v35 }
 0x65a   : > { %v3915_v17 = vsub.f32 %v1929_v6, %v1948_v46  ;;  %v2825_v6 = vld [vmem:[%s3530_s6 + $0x18] sm:$0xf0] }
 0x65b   : > { %v2828_v31 = vor.u32 %v2990_v28, %v2825_v6 }
 0x65c   : > { %v1956_v49 = vmul.f32 %v3915_v17, %v3915_v17 }
 0x65d   : > { %2156 = vmatpush.bf16.msra.mxu2 %v2828_v31 }
 0x65e   : > { %1963 = vadd.xlane.f32.xlu2 %v1956_v49 }
 0x661   : > { %2157 = vmatpush.bf16.msra.mxu2 %v2820_v22  ;;  %v3007_v22 = vld [vmem:[%s3553_s16 + $0x18] sm:$0xff] }
 0x6a9   : > { %v1958_v25 = vpop.xlane.xlu2 %1957 }
 0x6aa   : > { %v1965_v8 = vmul.f32 %v1958_v25, %v3897_v9 }
 0x6ac   : > { %v1969_v34 = vadd.f32 1e-05, %v1965_v8 }
 0x6ae   : > { %3176 = vrsqrt.f32 %v1969_v34  ;;  %vm1979_vm8 = vweird.f32 %v1969_v34 }
 0x6b1   : > { %v1960_v40 = vpop.xlane.xlu0 %1959 }
 0x6b2   : > { %v1966_v30 = vmul.f32 %v1960_v40, %v3897_v9  ;;  %v3016_v40 = vld [vmem:[%s3553_s16 + $0x60] sm:$0xff] }
 0x6b3   : > { %2332 = vmatpush.bf16.msra.mxu0 %v3016_v40 }
 0x6b4   : > { %v3177_v43 = vpop.eup %3176  ;;  %v1970_v44 = vadd.f32 1e-05, %v1966_v30  ;;  %v3015_v30 = vld [vmem:[%s3553_s16 + $0x58] sm:$0xff] }
 0x6b5   : > { %v1974_v45 = vmul.f32 %v3177_v43, %v1969_v34  ;;  %vm1980_vm7 = vweird.f32 %v3177_v43 }
 0x6b6   : > { %3178 = vrsqrt.f32 %v1970_v44  ;;  %vm1981_vm9 = vmor %vm1979_vm8, %vm1980_vm7  ;;  %vm1989_vm11 = vweird.f32 %v1970_v44 }
 0x6b7   : > { %v1975_v13 = vmul.f32 %v3177_v43, %v1974_v45  ;;  %2333 = vmatpush.bf16.msra.mxu0 %v3015_v30  ;;  %v3004_v45 = vld [vmem:[%s3553_s16] sm:$0xff] }
 0x6b9   : > { %v1976_v46 = vmul.f32 0.5, %v1975_v13  ;;  %v3013_v13 = vld [vmem:[%s3553_s16 + $0x48] sm:$0xff] }
 0x6bb   : > { %v1977_v49 = vsub.f32 1.5, %v1976_v46  ;;  %v3012_v46 = vld [vmem:[%s3553_s16 + $0x40] sm:$0xff] }
 0x6bc   : > { %v3179_v42 = vpop.eup %3178 }
 0x6bd   : > { %v1978_v50 = vmul.f32 %v3177_v43, %v1977_v49  ;;  %v1984_v39 = vmul.f32 %v3179_v42, %v1970_v44  ;;  %vm1990_vm10 = vweird.f32 %v3179_v42  ;;  %v3014_v44 = vld [vmem:[%s3553_s16 + $0x50] sm:$0xff]  ;;  %v2045_v49 = vld [vmem:[%s3546_s17] sm:$0x3] }
 0x6be   : > { %vm1991_vm12 = vmor %vm1989_vm11, %vm1990_vm10  ;;  %2334 = vmatpush.bf16.msra.mxu0 %v3014_v44 }
 0x6bf   : > { %v1985_v51 = vmul.f32 %v3179_v42, %v1984_v39  ;;  %v1982_v52 = vsel %vm1981_vm9, %v3177_v43, %v1978_v50  ;;  %v3005_v43 = vld [vmem:[%s3553_s16 + $0x8] sm:$0xff]  ;;  %v2047_v50 = vperm.slane %v2045_v49, 0 }
 0x6c0   : > { %v2013_v5 = vmul.f32 %v1982_v52, %v3900_v21 }
 0x6c1   : > { %v1986_v20 = vmul.f32 0.5, %v1985_v51 }
 0x6c2   : > { %v2018_v47 = vmul.f32 %v2017_v55, %v2013_v5  ;;  %2335 = vmatpush.bf16.msra.mxu0 %v3013_v13 }
 0x6c3   : > { %v1987_v53 = vsub.f32 1.5, %v1986_v20  ;;  %v2048_v20 = vperm.slane %v2045_v49, 1 }
 0x6c4   : > { %v3961_v61 = vadd.f32 %v2022_v60, %v2018_v47 }
 0x6c5   : > { %v1988_v56 = vmul.f32 %v3179_v42, %v1987_v53 }
 0x6c6   : > { %2336 = vmatpush.bf16.msra.mxu0 %v3012_v46 }
 0x6c7   : > { %v1992_v58 = vsel %vm1991_vm12, %v3179_v42, %v1988_v56 }
 0x6c8   : > { %v2014_v37 = vmul.f32 %v1992_v58, %v3905_v41  ;;  %v3011_v41 = vld [vmem:[%s3553_s16 + $0x38] sm:$0xff] }
 0x6c9   : > { %v1962_v48 = vpop.xlane.xlu1 %1961  ;;  %2310 = vmatpush.bf16.msrb.mxu3 %v3011_v41 }
 0x6ca   : > { %v1967_v4 = vmul.f32 %v1962_v48, %v3897_v9  ;;  %v2019_v21 = vmul.f32 %v2017_v55, %v2014_v37 }
 0x6cc   : > { %v1971_v0 = vadd.f32 1e-05, %v1967_v4  ;;  %v3963_v2 = vadd.f32 %v2022_v60, %v2019_v21 }
 0x6cd   : > { %2311 = vmatpush.bf16.msrb.mxu3 %v3010_v10 }
 0x6ce   : > { %3180 = vrsqrt.f32 %v1971_v0  ;;  %v2027_v3 = vpack.c.bf16 %v3963_v2, %v3961_v61  ;;  %vm1999_vm14 = vweird.f32 %v1971_v0 }
 0x6d0   : > { %2139 = vmatmul.bf16.vlgmr.msrb.gmra.mxu1 %v2027_v3  ;;  %2158 = vmatmul.bf16.vlgmr.msra.gmra.mxu2 %v2027_v3 }
 0x6d1   : > { %v1964_v1 = vpop.xlane.xlu2 %1963  ;;  %2312 = vmatpush.bf16.msrb.mxu3 %v3009_v54 }
 0x6d2   : > { %v1968_v7 = vmul.f32 %v1964_v1, %v3897_v9 }
 0x6d4   : > { %v3181_v12 = vpop.eup %3180  ;;  %v1972_v14 = vadd.f32 1e-05, %v1968_v7 }
 0x6d5   : > { %v1994_v15 = vmul.f32 %v3181_v12, %v1971_v0  ;;  %vm2000_vm13 = vweird.f32 %v3181_v12  ;;  %2313 = vmatpush.bf16.msrb.mxu3 %v3008_v59 }
 0x6d6   : > { %3182 = vrsqrt.f32 %v1972_v14  ;;  %vm2001_vm15 = vmor %vm1999_vm14, %vm2000_vm13  ;;  %vm2009_vm1 = vweird.f32 %v1972_v14 }
 0x6d7   : > { %v1995_v16 = vmul.f32 %v3181_v12, %v1994_v15 }
 0x6d9   : > { %v1996_v57 = vmul.f32 0.5, %v1995_v16  ;;  %2314 = vmatpush.bf16.msrb.mxu3 %v3007_v22  ;;  %v2213_v16 = vperm.slane %v3955_v18, 6 }
 0x6db   : > { %v1997_v23 = vsub.f32 1.5, %v1996_v57 }
 0x6dc   : > { %v3183_v24 = vpop.eup %3182 }
 0x6dd   : > { %v1998_v26 = vmul.f32 %v3181_v12, %v1997_v23  ;;  %v2004_v27 = vmul.f32 %v3183_v24, %v1972_v14  ;;  %vm2010_vm0 = vweird.f32 %v3183_v24 }
 0x6de   : > { %vm2011_vm2 = vmor %vm2009_vm1, %vm2010_vm0 }
 0x6df   : > { %v2005_v28 = vmul.f32 %v3183_v24, %v2004_v27  ;;  %v2002_v6 = vsel %vm2001_vm15, %v3181_v12, %v1998_v26 }
 0x6e0   : > { %v2015_v31 = vmul.f32 %v2002_v6, %v3910_v38 }
 0x6e1   : > { %v2006_v29 = vmul.f32 0.5, %v2005_v28 }
 0x6e2   : > { %v2020_v33 = vmul.f32 %v2017_v55, %v2015_v31 }
 0x6e3   : > { %v2007_v25 = vsub.f32 1.5, %v2006_v29 }
 0x6e4   : > { %v3977_v35 = vadd.f32 %v2022_v60, %v2020_v33 }
 0x6e5   : > { %v2008_v8 = vmul.f32 %v3183_v24, %v2007_v25 }
 0x6e7   : > { %v2012_v62 = vsel %vm2011_vm2, %v3183_v24, %v2008_v8 }
 0x6e8   : > { %v2016_v32 = vmul.f32 %v2012_v62, %v3915_v17  ;;  %v3006_v17 = vld [vmem:[%s3553_s16 + $0x10] sm:$0xff] }
 0x6e9   : > { %2315 = vmatpush.bf16.msrb.mxu3 %v3006_v17 }
 0x6ea   : > { %v2021_v34 = vmul.f32 %v2017_v55, %v2016_v32 }
 0x6ec   : > { %v3979_v36 = vadd.f32 %v2022_v60, %v2021_v34 }
 0x6ed   : > { %2316 = vmatpush.bf16.msrb.mxu3 %v3005_v43 }
 0x6ee   : > { %v2028_v38 = vpack.c.bf16 %v3979_v36, %v3977_v35 }
 0x6f0   : > { %2144 = vmatmul.bf16.gmra.mxu1 %v2028_v38  ;;  %2163 = vmatmul.bf16.gmra.mxu2 %v2028_v38 }
 0x6f1   : > { %2317 = vmatpush.bf16.msrb.mxu3 %v3004_v45 }
 0x74d   : > { %v2140_v42 = vpop.f32.mrf.mxu1 }
 0x74e   : > { %v2141_v51 = vadd.f32 %v2140_v42, %v2047_v50 }
 0x750   : > { %v2169_v5 = vmax.f32 %v2141_v51, 0.0 }
 0x753   : > { %v2159_v39 = vpop.f32.mrf.mxu2 }
 0x754   : > { %v2160_v56 = vadd.f32 %v2159_v39, %v2048_v20 }
 0x755   : > { %v2142_v52 = vpop.f32.mrf.mxu1 }
 0x756   : > { %v2143_v53 = vadd.f32 %v2142_v52, %v2047_v50  ;;  %v2170_v60 = vmax.f32 %v2160_v56, 0.0 }
 0x758   : > { %v2171_v55 = vmax.f32 %v2143_v53, 0.0 }
 0x75a   : > { %v2177_v58 = vpack.c.bf16 %v2171_v55, %v2169_v5 }
 0x75b   : > { %v2161_v37 = vpop.f32.mrf.mxu2 }
 0x75c   : > { %v2162_v47 = vadd.f32 %v2161_v37, %v2048_v20  ;;  %2318 = vmatmul.bf16.vlgmr.msrb.gmra.mxu3 %v2177_v58 }
 0x75e   : > { %v2172_v48 = vmax.f32 %v2162_v47, 0.0 }
 0x760   : > { %v2178_v4 = vpack.c.bf16 %v2172_v48, %v2170_v60 }
 0x762   : > { %2337 = vmatmul.bf16.vlgmr.msra.gmra.mxu0 %v2178_v4 }
 0x76d   : > { %v2145_v21 = vpop.f32.mrf.mxu1 }
 0x76e   : > { %v2146_v3 = vadd.f32 %v2145_v21, %v2047_v50 }
 0x770   : > { %v2173_v1 = vmax.f32 %v2146_v3, 0.0 }
 0x773   : > { %v2164_v0 = vpop.f32.mrf.mxu2 }
 0x774   : > { %v2165_v10 = vadd.f32 %v2164_v0, %v2048_v20 }
 0x775   : > { %v2147_v41 = vpop.f32.mrf.mxu1 }
 0x776   : > { %v2148_v63 = vadd.f32 %v2147_v41, %v2047_v50  ;;  %v2174_v15 = vmax.f32 %v2165_v10, 0.0  ;;  %v2432_v41 = vperm.slane %v3955_v18, 7 }
 0x778   : > { %v2175_v7 = vmax.f32 %v2148_v63, 0.0 }
 0x77a   : > { %v2179_v11 = vpack.c.bf16 %v2175_v7, %v2173_v1  ;;  %v3109_v7 = vld [vmem:[%s3551_s20 + $0x8] ss:$0 sm:$0xff] }
 0x77b   : > { %v2166_v12 = vpop.f32.mrf.mxu2 }
 0x77c   : > { %v2167_v14 = vadd.f32 %v2166_v12, %v2048_v20  ;;  %2323 = vmatmul.bf16.gmra.mxu3 %v2179_v11 }
 0x77e   : > { %v2176_v54 = vmax.f32 %v2167_v14, 0.0 }
 0x780   : > { %v2180_v19 = vpack.c.bf16 %v2176_v54, %v2174_v15 }
 0x782   : > { %2342 = vmatmul.bf16.gmra.mxu0 %v2180_v19 }
 0x7df   : > { %v2319_v57 = vpop.f32.mrf.mxu3  ;;  %v2338_v59 = vpop.f32.mrf.mxu0 }
 0x7e0   : > { %v2320_v23 = vadd.f32 %v2319_v57, %v2213_v16 }
 0x7e2   : > { %v2339_v24 = vadd.f32 %v2338_v59, %v2320_v23 }
 0x7e4   : > { %v2348_v26 = vadd.f32 %v2339_v24, %v3961_v61 }
 0x7e6   : > { %2352 = vadd.xlane.f32.xlu0 %v2348_v26 }
 0x7e7   : > { %v2321_v27 = vpop.f32.mrf.mxu3  ;;  %v2340_v29 = vpop.f32.mrf.mxu0 }
 0x7e8   : > { %v2322_v28 = vadd.f32 %v2321_v27, %v2213_v16 }
 0x7ea   : > { %v2341_v6 = vadd.f32 %v2340_v29, %v2322_v28 }
 0x7ec   : > { %v2349_v25 = vadd.f32 %v2341_v6, %v3963_v2 }
 0x7ee   : > { %2354 = vadd.xlane.f32.xlu1 %v2349_v25 }
 0x7ff   : > { %v2324_v31 = vpop.f32.mrf.mxu3  ;;  %v2343_v8 = vpop.f32.mrf.mxu0 }
 0x800   : > { %v2325_v62 = vadd.f32 %v2324_v31, %v2213_v16 }
 0x802   : > { %v2344_v32 = vadd.f32 %v2343_v8, %v2325_v62 }
 0x804   : > { %v2350_v33 = vadd.f32 %v2344_v32, %v3977_v35 }
 0x806   : > { %2356 = vadd.xlane.f32.xlu2 %v2350_v33 }
 0x807   : > { %v2326_v34 = vpop.f32.mrf.mxu3  ;;  %v2345_v22 = vpop.f32.mrf.mxu0 }
 0x808   : > { %v2327_v38 = vadd.f32 %v2326_v34, %v2213_v16 }
 0x80a   : > { %v2346_v40 = vadd.f32 %v2345_v22, %v2327_v38 }
 0x80c   : > { %v2351_v61 = vadd.f32 %v2346_v40, %v3979_v36 }
 0x80e   : > { %2358 = vadd.xlane.f32.xlu0 %v2351_v61 }
 0x859   : > { %v2353_v17 = vpop.xlane.xlu0 %2352 }
 0x85a   : > { %v2360_v30 = vmul.f32 %v2353_v17, %v3897_v9 }
 0x85c   : > { %v2364_v43 = vsub.f32 %v2348_v26, %v2360_v30 }
 0x85e   : > { %v2368_v2 = vmul.f32 %v2364_v43, %v2364_v43 }
 0x860   : > { %2372 = vadd.xlane.f32.xlu1 %v2368_v2 }
 0x861   : > { %v2355_v44 = vpop.xlane.xlu1 %2354 }
 0x862   : > { %v2361_v45 = vmul.f32 %v2355_v44, %v3897_v9 }
 0x864   : > { %v2365_v13 = vsub.f32 %v2349_v25, %v2361_v45 }
 0x866   : > { %v2369_v46 = vmul.f32 %v2365_v13, %v2365_v13 }
 0x868   : > { %2374 = vadd.xlane.f32.xlu2 %v2369_v46 }
 0x879   : > { %v2357_v35 = vpop.xlane.xlu2 %2356 }
 0x87a   : > { %v2362_v49 = vmul.f32 %v2357_v35, %v3897_v9 }
 0x87c   : > { %v4001_v42 = vsub.f32 %v2350_v33, %v2362_v49 }
 0x87e   : > { %v2370_v36 = vmul.f32 %v4001_v42, %v4001_v42 }
 0x880   : > { %2376 = vadd.xlane.f32.xlu0 %v2370_v36 }
 0x881   : > { %v2359_v50 = vpop.xlane.xlu0 %2358 }
 0x882   : > { %v2363_v39 = vmul.f32 %v2359_v50, %v3897_v9 }
 0x884   : > { %v4006_v51 = vsub.f32 %v2351_v61, %v2363_v39 }
 0x886   : > { %v2371_v52 = vmul.f32 %v4006_v51, %v4006_v51 }
 0x888   : > { %2378 = vadd.xlane.f32.xlu1 %v2371_v52 }
 0x8d3   : > { %v2373_v20 = vpop.xlane.xlu1 %2372 }
 0x8d4   : > { %v2380_v53 = vmul.f32 %v2373_v20, %v3897_v9 }
 0x8d6   : > { %v2384_v5 = vadd.f32 1e-05, %v2380_v53 }
 0x8d8   : > { %3184 = vrsqrt.f32 %v2384_v5  ;;  %vm2394_vm4 = vweird.f32 %v2384_v5 }
 0x8db   : > { %v2375_v55 = vpop.xlane.xlu2 %2374 }
 0x8dc   : > { %v2381_v56 = vmul.f32 %v2375_v55, %v3897_v9 }
 0x8de   : > { %v3185_v58 = vpop.eup %3184  ;;  %v2385_v37 = vadd.f32 1e-05, %v2381_v56 }
 0x8df   : > { %v2389_v47 = vmul.f32 %v3185_v58, %v2384_v5  ;;  %vm2395_vm3 = vweird.f32 %v3185_v58 }
 0x8e0   : > { %3186 = vrsqrt.f32 %v2385_v37  ;;  %vm2396_vm5 = vmor %vm2394_vm4, %vm2395_vm3  ;;  %vm2404_vm7 = vweird.f32 %v2385_v37 }
 0x8e1   : > { %v2390_v60 = vmul.f32 %v3185_v58, %v2389_v47 }
 0x8e3   : > { %v2391_v48 = vmul.f32 0.5, %v2390_v60 }
 0x8e5   : > { %v2392_v4 = vsub.f32 1.5, %v2391_v48 }
 0x8e6   : > { %v3187_v21 = vpop.eup %3186 }
 0x8e7   : > { %v2393_v0 = vmul.f32 %v3185_v58, %v2392_v4  ;;  %v2399_v3 = vmul.f32 %v3187_v21, %v2385_v37  ;;  %vm2405_vm6 = vweird.f32 %v3187_v21 }
 0x8e8   : > { %vm2406_vm8 = vmor %vm2404_vm7, %vm2405_vm6 }
 0x8e9   : > { %v2397_v63 = vsel %vm2396_vm5, %v3185_v58, %v2393_v0  ;;  %v2400_v1 = vmul.f32 %v3187_v21, %v2399_v3 }
 0x8ea   : > { %v2428_v10 = vmul.f32 %v2397_v63, %v2364_v43 }
 0x8eb   : > { %v2401_v11 = vmul.f32 0.5, %v2400_v1 }
 0x8ec   : > { %v2433_v12 = vmul.f32 %v2432_v41, %v2428_v10 }
 0x8ed   : > { %v2402_v14 = vsub.f32 1.5, %v2401_v11 }
 0x8ee   : > { %v2438_v15 = vadd.f32 %v3109_v7, %v2433_v12 }
 0x8ef   : > { %v2403_v54 = vmul.f32 %v3187_v21, %v2402_v14 }
 0x8f0   : > { %2442 = vst [vmem:[#allocation2 + $0x10] sm:$0xff] %v2438_v15 }
 0x8f1   : > { %v2407_v19 = vsel %vm2406_vm8, %v3187_v21, %v2403_v54 }
 0x8f2   : > { %v2429_v16 = vmul.f32 %v2407_v19, %v2365_v13 }
 0x8f3   : > { %v2377_v57 = vpop.xlane.xlu0 %2376 }
 0x8f4   : > { %v2434_v59 = vmul.f32 %v2432_v41, %v2429_v16  ;;  %v2382_v18 = vmul.f32 %v2377_v57, %v3897_v9 }
 0x8f6   : > { %v2439_v23 = vadd.f32 %v3109_v7, %v2434_v59  ;;  %v2386_v24 = vadd.f32 1e-05, %v2382_v18 }
 0x8f8   : > { %2443 = vst [vmem:[#allocation2] sm:$0xff] %v2439_v23  ;;  %3188 = vrsqrt.f32 %v2386_v24  ;;  %vm2414_vm10 = vweird.f32 %v2386_v24 }
 0x8fb   : > { %v2379_v26 = vpop.xlane.xlu1 %2378 }
 0x8fc   : > { %v2383_v27 = vmul.f32 %v2379_v26, %v3897_v9 }
 0x8fe   : > { %v3189_v28 = vpop.eup %3188  ;;  %v2387_v29 = vadd.f32 1e-05, %v2383_v27 }
 0x8ff   : > { %v2409_v6 = vmul.f32 %v3189_v28, %v2386_v24  ;;  %vm2415_vm9 = vweird.f32 %v3189_v28 }
 0x900   : > { %3190 = vrsqrt.f32 %v2387_v29  ;;  %vm2416_vm11 = vmor %vm2414_vm10, %vm2415_vm9  ;;  %vm2424_vm13 = vweird.f32 %v2387_v29 }
 0x901   : > { %v2410_v25 = vmul.f32 %v3189_v28, %v2409_v6 }
 0x903   : > { %v2411_v31 = vmul.f32 0.5, %v2410_v25 }
 0x905   : > { %v2412_v8 = vsub.f32 1.5, %v2411_v31 }
 0x906   : > { %v3191_v62 = vpop.eup %3190 }
 0x907   : > { %v2413_v32 = vmul.f32 %v3189_v28, %v2412_v8  ;;  %v2419_v33 = vmul.f32 %v3191_v62, %v2387_v29  ;;  %vm2425_vm12 = vweird.f32 %v3191_v62 }
 0x908   : > { %vm2426_vm14 = vmor %vm2424_vm13, %vm2425_vm12 }
 0x909   : > { %v2417_v34 = vsel %vm2416_vm11, %v3189_v28, %v2413_v32  ;;  %v2420_v38 = vmul.f32 %v3191_v62, %v2419_v33 }
 0x90a   : > { %v2430_v22 = vmul.f32 %v2417_v34, %v4001_v42 }
 0x90b   : > { %v2421_v40 = vmul.f32 0.5, %v2420_v38 }
 0x90c   : > { %v2435_v61 = vmul.f32 %v2432_v41, %v2430_v22 }
 0x90d   : > { %v2422_v9 = vsub.f32 1.5, %v2421_v40 }
 0x90e   : > { %v2440_v17 = vadd.f32 %v3109_v7, %v2435_v61 }
 0x90f   : > { %v2423_v30 = vmul.f32 %v3191_v62, %v2422_v9 }
 0x910   : > { %2444 = vst [vmem:[#allocation2 + $0x18] sm:$0xff] %v2440_v17 }
 0x911   : > { %v2427_v43 = vsel %vm2426_vm14, %v3191_v62, %v2423_v30 }
 0x912   : > { %v2431_v2 = vmul.f32 %v2427_v43, %v4006_v51 }
 0x914   : > { %v2436_v44 = vmul.f32 %v2432_v41, %v2431_v2  ;;  %2449 = sbr.rel (%p2941_p1) target bundleno = 2333 (0x91d), region = 76 }
 0x916   : > { %v2441_v45 = vadd.f32 %v3109_v7, %v2436_v44 }
 0x918   : > { %2445 = vst [vmem:[#allocation2 + $0x8] sm:$0xff] %v2441_v45 }
 0x919   : > { %v2452_v13 = vrot.slane %v2440_v17, 7  ;;  %vm2453_vm15 = vcmask 1041409  }
 0x91b   : > { %v2454_v46 = vsel %vm2453_vm15, %v2452_v13, %v2438_v15 }
 0x91c   : > { %2456 = vst [vmem:[#allocation11] sm:$0x3] %v2454_v46 }
 0x91d PF: > { %p3048_p2 = scmp.eq.s32.totalorder %s3461_s15, 2  ;;  %s4066_s17 = sld [smem:[#allocation21_spill]] }
 0x91e   : > { %s3381_s16 = smov [#allocation11]  }
 0x91f   : > { %s2465_s11 = sshll.u32 %s3381_s16, 4  ;;  %s2466_s11 = int_to_ptr.vmem [resolvable:$true] %s2465_s11 }
 0x923   : > { %s2467_s20 = sshll.u32 %s4066_s17, 4  ;;  %s2468_s20 = int_to_ptr.hbm [resolvable:$true] %s2467_s20 }
 0x924   : > { %3034 = dma.vmem_to_hbm [thread:$0]  (%p3048_p2), %s2466_s11, 32, %s2468_s20, [#allocation7]  }
 0x925   : > { %3344 = dma.done.wait (%p3048_p2), [#allocation7], 32  }
 0x926   : > { %3346 = vsyncadd (%p3048_p2), [#allocation7], 4294967264 }
 0x927 PF: > { %s4067_s12 = sld [smem:[#allocation16_spill]]  ;;  %s4071_s30 = smov %s3353_s10 }
 0x928   : > { %s4068_s25 = sld [smem:[#allocation15_spill]] }
 0x929   : > { %s4069_s11 = sld [smem:[#allocation18_spill]] }
 0x92a   : > { %s4070_s15 = sld [smem:[#allocation17_spill]] }
 0x92d   : > { %s26_s14 = sadd.s32 1, %s4067_s12   ;;  %s4073_s12 = smov %s3365_s13 }
 0x92e   : > { %p23_p3 = scmp.ge.s32.totalorder %s26_s14, 5   ;;  %s4072_s10 = smov %s4068_s25 }
 0x930   : > { %s4074_s13 = smov %s4070_s15  ;;  %25 = sbr.rel (!%p23_p3) target bundleno = 11 (0xb), region = 159 }
 0x935   :  { %2481 = vsyncpa [#allocation6], 1 }
 0x936   :  { %2483 = vsyncpa [#allocation6 + $0x1], 1 }
 0x937   :  { %2484 = vsyncpa [#allocation9], 1 }
 0x938   :  { %2486 = vsyncpa [#allocation9 + $0x1], 1 }
 0x939   :  { %2487 = vsyncpa [#allocation7], 1 }
 0x93a   :  { %2489 = vsyncpa [#allocation7 + $0x1], 1 }

</bundles_post_ra>
